<compile_context>
chip_gen: v7x
topology: tpu7x:2x2x1
jax: 0.10.0
libtpu: 0.0.40
codegen_flags: <defaults>
</compile_context>

<pallas_src>
import math
from functools import partial

import numpy as np
import jax
import jax.numpy as jnp
from jax import lax
from jax.experimental import pallas as pl
from jax.experimental.pallas import tpu as pltpu


# ---------------------------------------------------------------------------
# Fused multi-layer transformer encoder kernel
# ---------------------------------------------------------------------------
def _add_ln(x, y, g, b, eps=1e-5):
    z = x + y
    mu = jnp.mean(z, axis=-1, keepdims=True)
    var = jnp.mean(jnp.square(z - mu), axis=-1, keepdims=True)
    return (z - mu) * lax.rsqrt(var + eps) * g + b


def _encoder_stack_kernel(
        x_ref, bias_ref,
        wq_ref, wk_ref, wv_ref, bq_ref, bk_ref, bv_ref,
        wo_ref, bo_ref,
        n1g_ref, n1b_ref,
        w1_ref, b1_ref, w2_ref, b2_ref,
        n2g_ref, n2b_ref,
        o_ref,
        *, num_heads, scale, block_b, seq):
    f32, bf16 = jnp.float32, jnp.bfloat16
    S = seq
    D = x_ref.shape[-1]
    dh = D // num_heads
    M = block_b * S

    layer = pl.program_id(1)

    # Layer 0: seed the resident activation buffer. o_ref's block index is
    # constant along the layer axis, so it stays in VMEM for all layers.
    @pl.when(layer == 0)
    def _():
        o_ref[...] = x_ref[...]

    x = o_ref[...].astype(f32).reshape(M, D)          # (Bt*S, D)
    xb = x.astype(bf16)

    # ---- QKV with pre-split weights: no in-tile lane slicing of a fused qkv ----
    q = jnp.dot(xb, wq_ref[...], preferred_element_type=f32) + bq_ref[...]
    k = jnp.dot(xb, wk_ref[...], preferred_element_type=f32) + bk_ref[...]
    v = jnp.dot(xb, wv_ref[...], preferred_element_type=f32) + bv_ref[...]
    qb, kb, vb = q.astype(bf16), k.astype(bf16), v.astype(bf16)

    bias = bias_ref[...].astype(f32)                  # (Bt, 1, S)

    # ---- attention per batch element; heads concatenated so the out-proj is
    #      ONE (M, D) x (D, D) MXU pass ----
    per_b = []
    for bi in range(block_b):                         # static unroll (Bt small)
        row = slice(bi * S, (bi + 1) * S)             # sublane slice, S % 8 == 0
        bias_b = jnp.broadcast_to(bias[bi], (S, S))   # hoisted out of head loop
        heads = []
        for h in range(num_heads):                    # static unroll (H small)
            col = slice(h * dh, (h + 1) * dh)
            qh, kh, vh = qb[row, col], kb[row, col], vb[row, col]
            s = lax.dot_general(qh, kh, (((1,), (1,)), ((), ())),
                                preferred_element_type=f32) * scale   # (S, S)
            s = s + bias_b
            m = jnp.max(s, axis=-1, keepdims=True)
            p = jnp.exp(s - m)
            denom = jnp.sum(p, axis=-1, keepdims=True)
            p = p * pl.reciprocal(denom, approx=True)                  # EUP slot
            heads.append(jnp.dot(p.astype(bf16), vh,
                                 preferred_element_type=f32))          # (S, dh)
        per_b.append(jnp.concatenate(heads, axis=-1))                  # (S, D)
    attn = per_b[0] if block_b == 1 else jnp.concatenate(per_b, axis=0)

    sa = jnp.dot(attn.astype(bf16), wo_ref[...],
                 preferred_element_type=f32) + bo_ref[...]

    # ---- residual + LayerNorm 1 (post-norm) ----
    x1 = _add_ln(x, sa, n1g_ref[...], n1b_ref[...])

    # ---- FFN with VMEM-resident (M, dim_ff) intermediate ----
    h1 = jnp.dot(x1.astype(bf16), w1_ref[...],
                 preferred_element_type=f32) + b1_ref[...]
    h1 = jnp.maximum(h1, 0.0)
    ff = jnp.dot(h1.astype(bf16), w2_ref[...],
                 preferred_element_type=f32) + b2_ref[...]

    # ---- residual + LayerNorm 2; write back into the resident buffer ----
    o_ref[...] = _add_ln(x1, ff, n2g_ref[...], n2b_ref[...]).reshape(block_b, S, D)


def encoder_stack(tokens, bias, enc, num_heads, *, block_b=None):
    """tokens: (B, S, D) f32, bias: (B, 1, S) additive key-padding mask."""
    B, S, D = tokens.shape
    L = enc["wq"].shape[0]
    dff = enc["w1"].shape[-1]
    dh = D // num_heads
    scale = 1.0 / math.sqrt(dh)
    f32, bf16 = jnp.float32, jnp.bfloat16

    if block_b is None:
        if B <= 2:
            block_b = 1          # keep >=2 batch tiles so both v7x TCs get work
        else:
            block_b = max(d for d in range(1, B // 2 + 1) if B % d == 0)
    nb = B // block_b

    def wspec(*shape):
        zeros = (0,) * len(shape)
        return pl.BlockSpec((None,) + shape, lambda b, l: (l,) + zeros)

    in_specs = [
        pl.BlockSpec((block_b, S, D), lambda b, l: (b, 0, 0)),   # tokens
        pl.BlockSpec((block_b, 1, S), lambda b, l: (b, 0, 0)),   # key-pad bias
        wspec(D, D), wspec(D, D), wspec(D, D),                   # wq wk wv
        wspec(1, D), wspec(1, D), wspec(1, D),                   # bq bk bv
        wspec(D, D), wspec(1, D),                                # wo bo
        wspec(1, D), wspec(1, D),                                # norm1
        wspec(D, dff), wspec(1, dff),                            # lin1
        wspec(dff, D), wspec(1, D),                              # lin2
        wspec(1, D), wspec(1, D),                                # norm2
    ]
    out_spec = pl.BlockSpec((block_b, S, D), lambda b, l: (b, 0, 0))

    # advisory hint so XLA schedules the custom call sensibly vs. eigh/gather
    flops = 2 * B * L * S * (4 * D * D + 2 * S * D + 2 * D * dff)
    transcendentals = B * L * num_heads * S * S
    bytes_accessed = (2 * B * S * D * 4 + B * S * 4
                      + L * 2 * (4 * D * D + 2 * D * dff))

    return pl.pallas_call(
        partial(_encoder_stack_kernel, num_heads=num_heads, scale=scale,
                block_b=block_b, seq=S),
        out_shape=jax.ShapeDtypeStruct((B, S, D), f32),
        grid=(nb, L),
        in_specs=in_specs,
        out_specs=out_spec,
        compiler_params=pltpu.CompilerParams(
            dimension_semantics=("parallel", "arbitrary")),
        cost_estimate=pl.CostEstimate(flops=flops,
                                      transcendentals=transcendentals,
                                      bytes_accessed=bytes_accessed),
    )(
        tokens.astype(f32), bias.astype(f32),
        enc["wq"].astype(bf16), enc["wk"].astype(bf16), enc["wv"].astype(bf16),
        enc["bq"].astype(f32), enc["bk"].astype(f32), enc["bv"].astype(f32),
        enc["wo"].astype(bf16), enc["bo"].astype(f32),
        enc["n1g"].astype(f32), enc["n1b"].astype(f32),
        enc["w1"].astype(bf16), enc["b1"].astype(f32),
        enc["w2"].astype(bf16), enc["b2"].astype(f32),
        enc["n2g"].astype(f32), enc["n2b"].astype(f32),
    )


# ---------------------------------------------------------------------------
# Tokenizer glue (plain JAX / host bookkeeping)
# ---------------------------------------------------------------------------
def node_identifiers_laplacian(edge_index_np, node_counts, d_p):
    """Laplacian eigenvectors per graph, padded/truncated to d_p columns."""
    # TODO(synk): eigendecomposition stays in XLA (no Pallas equivalent); eigvec
    #             sign/order is solver-dependent (matches torch only up to sign).
    P_list = []
    offset = 0
    for n in node_counts:
        m = (edge_index_np[0] >= offset) & (edge_index_np[0] < offset + n)
        sub = edge_index_np[:, m] - offset
        adj = jnp.zeros((n, n), jnp.float32).at[sub[0], sub[1]].set(1.0)
        deg = adj.sum(axis=1)
        lap = jnp.diag(deg) - adj
        _, eigvecs = jnp.linalg.eigh(lap)
        if n < d_p:
            eigvecs = jnp.pad(eigvecs, ((0, 0), (0, d_p - n)))
        elif n > d_p:
            eigvecs = eigvecs[:, :d_p]
        P_list.append(eigvecs)
        offset += n
    return jnp.concatenate(P_list, axis=0)


def prepare_token_indices(node_counts, edge_counts):
    """Static (numpy) gather-index table mapping every (graph, slot) to a row of
    [graph_token | node_proj rows | edge_proj rows | zero_row]."""
    B = len(node_counts)
    max_n, max_e = max(node_counts), max(edge_counts)
    seq_len = 1 + max_n + max_e                      # use_graph_token=True
    seq_pad = ((seq_len + 7) // 8) * 8               # sublane-aligned sequence
    nn_total, ne_total = sum(node_counts), sum(edge_counts)
    zero_row = 1 + nn_total + ne_total
    idx = np.full((B, seq_pad), zero_row, dtype=np.int32)
    mask = np.zeros((B, seq_pad), dtype=bool)
    n_ptr = np.concatenate([[0], np.cumsum(node_counts)]).astype(np.int64)
    e_ptr = np.concatenate([[0], np.cumsum(edge_counts)]).astype(np.int64)
    for i in range(B):
        idx[i, 0] = 0
        mask[i, 0] = True
        nc = node_counts[i]
        idx[i, 1:1 + nc] = 1 + np.arange(n_ptr[i], n_ptr[i] + nc)
        mask[i, 1:1 + nc] = True
        ec = edge_counts[i]
        base = 1 + max_n
        idx[i, base:base + ec] = 1 + nn_total + np.arange(e_ptr[i], e_ptr[i] + ec)
        mask[i, base:base + ec] = True
    return idx, mask, seq_len


def tokengt_forward(params, x, edge_index_np, edge_attr, node_counts, edge_counts,
                    *, d_p, d_e, hidden_dim, num_heads):
    f32 = jnp.float32
    num_nodes = x.shape[0]
    num_edges = edge_index_np.shape[1]

    P = node_identifiers_laplacian(edge_index_np, node_counts, d_p)
    E_V = jnp.broadcast_to(params["E_V"], (num_nodes, d_e))
    E_E = jnp.broadcast_to(params["E_E"], (num_edges, d_e))

    # Tokenizer projections are far too small to amortize a pallas_call launch
    # + HBM<->VMEM DMA; plain XLA dots fuse with the concat/gather below.
    ea = edge_attr.astype(f32) @ params["edge_proj_w"] + params["edge_proj_b"]
    P_u = P[edge_index_np[0]]
    P_v = P[edge_index_np[1]]

    X_v = jnp.concatenate([x.astype(f32), P, P, E_V], axis=1)
    X_e = jnp.concatenate([ea, P_u, P_v, E_E], axis=1)
    X_all = jnp.concatenate([X_v, X_e], axis=0)
    X_all_proj = X_all @ params["w_in_w"] + params["w_in_b"]

    # Vectorized token assembly: one gather instead of per-graph scatters.
    idx, mask_np, seq_len = prepare_token_indices(node_counts, edge_counts)
    all_rows = jnp.concatenate(
        [params["graph_token"].astype(f32),
         X_all_proj,
         jnp.zeros((1, hidden_dim), f32)], axis=0)
    tokens = jnp.take(all_rows, jnp.asarray(idx.reshape(-1)), axis=0)
    tokens = tokens.reshape(idx.shape[0], idx.shape[1], hidden_dim)
    masks = jnp.asarray(mask_np)

    # src_key_padding_mask -> additive bias (large finite negative; exp
    # underflows to 0 so it equals -inf here, but stays NaN-proof).
    bias = jnp.where(masks, 0.0, -1e30).astype(f32)[:, None, :]

    num_layers = params["enc"]["wq"].shape[0]
    out = tokens
    if num_layers > 0:
        out = encoder_stack(tokens, bias, params["enc"], num_heads)

    # drop the alignment padding: return the module's true sequence length
    return out[:, :seq_len], masks[:, :seq_len]


# ---------------------------------------------------------------------------
# Deterministic parameter init (Xavier uniform, zero biases)
# ---------------------------------------------------------------------------
def xavier(key, shape):
    fan_in, fan_out = shape[-2], shape[-1]
    bound = math.sqrt(6.0 / (fan_in + fan_out))
    return jax.random.uniform(key, shape, jnp.float32, -bound, bound)


def make_params(key, *, input_feat_dim, hidden_dim, num_layers, d_p, d_e, dim_ff):
    input_dim = input_feat_dim + 2 * d_p + d_e
    D, L, F = hidden_dim, num_layers, dim_ff
    keys = jax.random.split(key, 6)
    params = {
        "E_V": xavier(keys[0], (1, d_e)),
        "E_E": xavier(keys[1], (1, d_e)),
        "edge_proj_w": xavier(keys[2], (3, input_feat_dim)),
        "edge_proj_b": jnp.zeros((input_feat_dim,), jnp.float32),
        "w_in_w": xavier(keys[3], (input_dim, hidden_dim)),
        "w_in_b": jnp.zeros((hidden_dim,), jnp.float32),
        "graph_token": xavier(keys[4], (1, hidden_dim)),
    }
    ek = jax.random.split(keys[5], 6)
    params["enc"] = {
        # per-layer weights stacked along a leading num_layers axis
        "wq": xavier(ek[0], (L, D, D)),
        "wk": xavier(ek[1], (L, D, D)),
        "wv": xavier(ek[2], (L, D, D)),
        "bq": jnp.zeros((L, 1, D), jnp.float32),
        "bk": jnp.zeros((L, 1, D), jnp.float32),
        "bv": jnp.zeros((L, 1, D), jnp.float32),
        "wo": xavier(ek[3], (L, D, D)),
        "bo": jnp.zeros((L, 1, D), jnp.float32),
        "n1g": jnp.ones((L, 1, D), jnp.float32),
        "n1b": jnp.zeros((L, 1, D), jnp.float32),
        "w1": xavier(ek[4], (L, D, F)),
        "b1": jnp.zeros((L, 1, F), jnp.float32),
        "w2": xavier(ek[5], (L, F, D)),
        "b2": jnp.zeros((L, 1, D), jnp.float32),
        "n2g": jnp.ones((L, 1, D), jnp.float32),
        "n2b": jnp.zeros((L, 1, D), jnp.float32),
    }
    return params


# ---------------------------------------------------------------------------
if __name__ == "__main__":
    input_feat_dim = 9
    hidden_dim = 32
    num_layers = 2
    num_heads = 4
    d_p = 8
    d_e = 8
    dim_ff = 2048  # nn.TransformerEncoderLayer default dim_feedforward

    key = jax.random.PRNGKey(0)
    kx, ke, kp = jax.random.split(key, 3)

    # Two small graphs: graph0 has 5 nodes / 8 directed edges, graph1 has 6 / 10.
    node_counts = [5, 6]
    g0 = [(0, 1), (1, 0), (1, 2), (2, 1), (2, 3), (3, 2), (3, 4), (4, 3)]
    g1 = [(5, 6), (6, 5), (6, 7), (7, 6), (7, 8), (8, 7), (8, 9), (9, 8), (9, 10), (10, 9)]
    edge_index = np.array(g0 + g1, dtype=np.int32).T  # (2, 18)
    edge_counts = [len(g0), len(g1)]

    num_nodes = sum(node_counts)
    num_edges = edge_index.shape[1]

    x = jax.random.normal(kx, (num_nodes, input_feat_dim), jnp.float32)
    edge_attr = jax.random.normal(ke, (num_edges, 3), jnp.float32)

    params = make_params(kp, input_feat_dim=input_feat_dim, hidden_dim=hidden_dim,
                         num_layers=num_layers, d_p=d_p, d_e=d_e, dim_ff=dim_ff)

    out, attention_masks = tokengt_forward(
        params, x, edge_index, edge_attr, node_counts, edge_counts,
        d_p=d_p, d_e=d_e, hidden_dim=hidden_dim, num_heads=num_heads)

    jax.block_until_ready(out)
    jax.block_until_ready(attention_masks)
    assert out.shape == (2, 1 + max(node_counts) + max(edge_counts), hidden_dim)
    assert attention_masks.shape == (2, 1 + max(node_counts) + max(edge_counts))
    assert bool(jnp.all(jnp.isfinite(out)))
    print("KERNEL_OK")
</pallas_src>

<mosaic_0001>
module attributes {stable_mosaic.version = 11 : i64} {
  func.func @_encoder_stack_kernel(%arg0: i32, %arg1: i32, %arg2: memref<1x24x32xf32, #tpu.memory_space<vmem>>, %arg3: memref<1x1x24xf32, #tpu.memory_space<vmem>>, %arg4: memref<1x32x32xbf16, #tpu.memory_space<vmem>>, %arg5: memref<1x32x32xbf16, #tpu.memory_space<vmem>>, %arg6: memref<1x32x32xbf16, #tpu.memory_space<vmem>>, %arg7: memref<1x1x32xf32, #tpu.memory_space<vmem>>, %arg8: memref<1x1x32xf32, #tpu.memory_space<vmem>>, %arg9: memref<1x1x32xf32, #tpu.memory_space<vmem>>, %arg10: memref<1x32x32xbf16, #tpu.memory_space<vmem>>, %arg11: memref<1x1x32xf32, #tpu.memory_space<vmem>>, %arg12: memref<1x1x32xf32, #tpu.memory_space<vmem>>, %arg13: memref<1x1x32xf32, #tpu.memory_space<vmem>>, %arg14: memref<1x32x2048xbf16, #tpu.memory_space<vmem>>, %arg15: memref<1x1x2048xf32, #tpu.memory_space<vmem>>, %arg16: memref<1x2048x32xbf16, #tpu.memory_space<vmem>>, %arg17: memref<1x1x32xf32, #tpu.memory_space<vmem>>, %arg18: memref<1x1x32xf32, #tpu.memory_space<vmem>>, %arg19: memref<1x1x32xf32, #tpu.memory_space<vmem>>, %arg20: memref<1x24x32xf32, #tpu.memory_space<vmem>>) attributes {dimension_semantics = [#tpu.dimension_semantics<parallel>, #tpu.dimension_semantics<arbitrary>], iteration_bounds = array<i64: 2, 2>, scalar_prefetch = 0 : i64, scratch_operands = 0 : i64, tpu.core_type = #tpu.core_type<tc>, window_params = [{transform_indices = @transform_0, window_bounds = array<i64: 1, 24, 32>}, {transform_indices = @transform_1, window_bounds = array<i64: 1, 1, 24>}, {transform_indices = @transform_2, window_bounds = array<i64: 1, 32, 32>}, {transform_indices = @transform_3, window_bounds = array<i64: 1, 32, 32>}, {transform_indices = @transform_4, window_bounds = array<i64: 1, 32, 32>}, {transform_indices = @transform_5, window_bounds = array<i64: 1, 1, 32>}, {transform_indices = @transform_6, window_bounds = array<i64: 1, 1, 32>}, {transform_indices = @transform_7, window_bounds = array<i64: 1, 1, 32>}, {transform_indices = @transform_8, window_bounds = array<i64: 1, 32, 32>}, {transform_indices = @transform_9, window_bounds = array<i64: 1, 1, 32>}, {transform_indices = @transform_10, window_bounds = array<i64: 1, 1, 32>}, {transform_indices = @transform_11, window_bounds = array<i64: 1, 1, 32>}, {transform_indices = @transform_12, window_bounds = array<i64: 1, 32, 2048>}, {transform_indices = @transform_13, window_bounds = array<i64: 1, 1, 2048>}, {transform_indices = @transform_14, window_bounds = array<i64: 1, 2048, 32>}, {transform_indices = @transform_15, window_bounds = array<i64: 1, 1, 32>}, {transform_indices = @transform_16, window_bounds = array<i64: 1, 1, 32>}, {transform_indices = @transform_17, window_bounds = array<i64: 1, 1, 32>}, {transform_indices = @transform_18, window_bounds = array<i64: 1, 24, 32>}]} {
    %c0_i32 = arith.constant 0 : i32
    %0 = arith.cmpi eq, %arg1, %c0_i32 : i32
    %1 = arith.extui %0 : i1 to i32
    %c0_i32_0 = arith.constant 0 : i32
    %2 = arith.cmpi ne, %1, %c0_i32_0 : i32
    scf.if %2 {
      %c0_93 = arith.constant 0 : index
      %c0_94 = arith.constant 0 : index
      %c0_95 = arith.constant 0 : index
      %193 = vector.load %arg2[%c0_93, %c0_94, %c0_95] : memref<1x24x32xf32, #tpu.memory_space<vmem>>, vector<1x24x32xf32>
      %c0_96 = arith.constant 0 : index
      %c0_97 = arith.constant 0 : index
      %c0_98 = arith.constant 0 : index
      %194 = vector.load %arg20[%c0_96, %c0_97, %c0_98] : memref<1x24x32xf32, #tpu.memory_space<vmem>>, vector<1x24x32xf32>
      tpu.vector_store %arg20[%c0_96, %c0_97, %c0_98], %193 {strides = array<i32>} : memref<1x24x32xf32, #tpu.memory_space<vmem>>, vector<1x24x32xf32>,
    } else {
    }
    %c0 = arith.constant 0 : index
    %c0_1 = arith.constant 0 : index
    %c0_2 = arith.constant 0 : index
    %3 = vector.load %arg20[%c0, %c0_1, %c0_2] : memref<1x24x32xf32, #tpu.memory_space<vmem>>, vector<1x24x32xf32>
    %4 = vector.shape_cast %3 : vector<1x24x32xf32> to vector<24x32xf32>
    %5 = arith.truncf %4 : vector<24x32xf32> to vector<24x32xbf16>
    %c0_3 = arith.constant 0 : index
    %c0_4 = arith.constant 0 : index
    %c0_5 = arith.constant 0 : index
    %6 = vector.load %arg4[%c0_3, %c0_4, %c0_5] : memref<1x32x32xbf16, #tpu.memory_space<vmem>>, vector<1x32x32xbf16>
    %7 = vector.shape_cast %6 : vector<1x32x32xbf16> to vector<32x32xbf16>
    %cst = arith.constant dense<0.000000e+00> : vector<24x32xf32>
    %8 = tpu.matmul %5, %7, %cst {dimension_numbers = #tpu.dot_dimension_numbers<[1], [0], [0], [1], [0, 0, 1, 1], [], []>} : vector<24x32xbf16>, vector<32x32xbf16>, vector<24x32xf32> -> vector<24x32xf32>
    %c0_6 = arith.constant 0 : index
    %c0_7 = arith.constant 0 : index
    %c0_8 = arith.constant 0 : index
    %9 = vector.load %arg7[%c0_6, %c0_7, %c0_8] : memref<1x1x32xf32, #tpu.memory_space<vmem>>, vector<1x1x32xf32>
    %10 = vector.shape_cast %9 : vector<1x1x32xf32> to vector<1x32xf32>
    %11 = vector.broadcast %10 : vector<1x32xf32> to vector<24x32xf32>
    %12 = arith.addf %8, %11 : vector<24x32xf32>
    %c0_9 = arith.constant 0 : index
    %c0_10 = arith.constant 0 : index
    %c0_11 = arith.constant 0 : index
    %13 = vector.load %arg5[%c0_9, %c0_10, %c0_11] : memref<1x32x32xbf16, #tpu.memory_space<vmem>>, vector<1x32x32xbf16>
    %14 = vector.shape_cast %13 : vector<1x32x32xbf16> to vector<32x32xbf16>
    %cst_12 = arith.constant dense<0.000000e+00> : vector<24x32xf32>
    %15 = tpu.matmul %5, %14, %cst_12 {dimension_numbers = #tpu.dot_dimension_numbers<[1], [0], [0], [1], [0, 0, 1, 1], [], []>} : vector<24x32xbf16>, vector<32x32xbf16>, vector<24x32xf32> -> vector<24x32xf32>
    %c0_13 = arith.constant 0 : index
    %c0_14 = arith.constant 0 : index
    %c0_15 = arith.constant 0 : index
    %16 = vector.load %arg8[%c0_13, %c0_14, %c0_15] : memref<1x1x32xf32, #tpu.memory_space<vmem>>, vector<1x1x32xf32>
    %17 = vector.shape_cast %16 : vector<1x1x32xf32> to vector<1x32xf32>
    %18 = vector.broadcast %17 : vector<1x32xf32> to vector<24x32xf32>
    %19 = arith.addf %15, %18 : vector<24x32xf32>
    %c0_16 = arith.constant 0 : index
    %c0_17 = arith.constant 0 : index
    %c0_18 = arith.constant 0 : index
    %20 = vector.load %arg6[%c0_16, %c0_17, %c0_18] : memref<1x32x32xbf16, #tpu.memory_space<vmem>>, vector<1x32x32xbf16>
    %21 = vector.shape_cast %20 : vector<1x32x32xbf16> to vector<32x32xbf16>
    %cst_19 = arith.constant dense<0.000000e+00> : vector<24x32xf32>
    %22 = tpu.matmul %5, %21, %cst_19 {dimension_numbers = #tpu.dot_dimension_numbers<[1], [0], [0], [1], [0, 0, 1, 1], [], []>} : vector<24x32xbf16>, vector<32x32xbf16>, vector<24x32xf32> -> vector<24x32xf32>
    %c0_20 = arith.constant 0 : index
    %c0_21 = arith.constant 0 : index
    %c0_22 = arith.constant 0 : index
    %23 = vector.load %arg9[%c0_20, %c0_21, %c0_22] : memref<1x1x32xf32, #tpu.memory_space<vmem>>, vector<1x1x32xf32>
    %24 = vector.shape_cast %23 : vector<1x1x32xf32> to vector<1x32xf32>
    %25 = vector.broadcast %24 : vector<1x32xf32> to vector<24x32xf32>
    %26 = arith.addf %22, %25 : vector<24x32xf32>
    %27 = arith.truncf %12 : vector<24x32xf32> to vector<24x32xbf16>
    %28 = arith.truncf %19 : vector<24x32xf32> to vector<24x32xbf16>
    %29 = arith.truncf %26 : vector<24x32xf32> to vector<24x32xbf16>
    %c0_23 = arith.constant 0 : index
    %c0_24 = arith.constant 0 : index
    %c0_25 = arith.constant 0 : index
    %30 = vector.load %arg3[%c0_23, %c0_24, %c0_25] : memref<1x1x24xf32, #tpu.memory_space<vmem>>, vector<1x1x24xf32>
    %31 = vector.shape_cast %30 : vector<1x1x24xf32> to vector<1x24xf32>
    %32 = vector.shape_cast %31 : vector<1x24xf32> to vector<1x24xf32>
    %33 = vector.broadcast %32 : vector<1x24xf32> to vector<24x24xf32>
    %34 = vector.extract_strided_slice %27 {offsets = [0, 0], sizes = [24, 8], strides = [1, 1]} : vector<24x32xbf16> to vector<24x8xbf16>
    %35 = vector.extract_strided_slice %28 {offsets = [0, 0], sizes = [24, 8], strides = [1, 1]} : vector<24x32xbf16> to vector<24x8xbf16>
    %36 = vector.extract_strided_slice %29 {offsets = [0, 0], sizes = [24, 8], strides = [1, 1]} : vector<24x32xbf16> to vector<24x8xbf16>
    %cst_26 = arith.constant dense<0.000000e+00> : vector<24x24xf32>
    %37 = tpu.matmul %34, %35, %cst_26 {dimension_numbers = #tpu.dot_dimension_numbers<[1], [1], [0], [0], [0, 0, 1, 0], [], []>} : vector<24x8xbf16>, vector<24x8xbf16>, vector<24x24xf32> -> vector<24x24xf32>
    %cst_27 = arith.constant 0.353553385 : f32
    %38 = vector.broadcast %cst_27 : f32 to vector<24x24xf32>
    %39 = arith.mulf %37, %38 : vector<24x24xf32>
    %40 = arith.addf %39, %33 : vector<24x24xf32>
    %cst_28 = arith.constant dense<0xFF800000> : vector<24xf32>
    %41 = vector.multi_reduction <maximumf>, %40, %cst_28 [1] : vector<24x24xf32> to vector<24xf32>
    %42 = vector.shape_cast %41 : vector<24xf32> to vector<24x1xf32>
    %43 = vector.broadcast %42 : vector<24x1xf32> to vector<24x24xf32>
    %44 = arith.subf %40, %43 : vector<24x24xf32>
    %45 = math.exp %44 : vector<24x24xf32>
    %cst_29 = arith.constant dense<0.000000e+00> : vector<24xf32>
    %46 = vector.multi_reduction <add>, %45, %cst_29 [1] : vector<24x24xf32> to vector<24xf32>
    %47 = vector.shape_cast %46 : vector<24xf32> to vector<24x1xf32>
    %48 = tpu.reciprocal %47 {approx = true} : vector<24x1xf32> -> vector<24x1xf32>
    %49 = vector.broadcast %48 : vector<24x1xf32> to vector<24x24xf32>
    %50 = arith.mulf %45, %49 : vector<24x24xf32>
    %51 = arith.truncf %50 : vector<24x24xf32> to vector<24x24xbf16>
    %cst_30 = arith.constant dense<0.000000e+00> : vector<24x8xf32>
    %52 = tpu.matmul %51, %36, %cst_30 {dimension_numbers = #tpu.dot_dimension_numbers<[1], [0], [0], [1], [0, 0, 1, 1], [], []>} : vector<24x24xbf16>, vector<24x8xbf16>, vector<24x8xf32> -> vector<24x8xf32>
    %53 = vector.extract_strided_slice %27 {offsets = [0, 8], sizes = [24, 8], strides = [1, 1]} : vector<24x32xbf16> to vector<24x8xbf16>
    %54 = vector.extract_strided_slice %28 {offsets = [0, 8], sizes = [24, 8], strides = [1, 1]} : vector<24x32xbf16> to vector<24x8xbf16>
    %55 = vector.extract_strided_slice %29 {offsets = [0, 8], sizes = [24, 8], strides = [1, 1]} : vector<24x32xbf16> to vector<24x8xbf16>
    %cst_31 = arith.constant dense<0.000000e+00> : vector<24x24xf32>
    %56 = tpu.matmul %53, %54, %cst_31 {dimension_numbers = #tpu.dot_dimension_numbers<[1], [1], [0], [0], [0, 0, 1, 0], [], []>} : vector<24x8xbf16>, vector<24x8xbf16>, vector<24x24xf32> -> vector<24x24xf32>
    %cst_32 = arith.constant 0.353553385 : f32
    %57 = vector.broadcast %cst_32 : f32 to vector<24x24xf32>
    %58 = arith.mulf %56, %57 : vector<24x24xf32>
    %59 = arith.addf %58, %33 : vector<24x24xf32>
    %cst_33 = arith.constant dense<0xFF800000> : vector<24xf32>
    %60 = vector.multi_reduction <maximumf>, %59, %cst_33 [1] : vector<24x24xf32> to vector<24xf32>
    %61 = vector.shape_cast %60 : vector<24xf32> to vector<24x1xf32>
    %62 = vector.broadcast %61 : vector<24x1xf32> to vector<24x24xf32>
    %63 = arith.subf %59, %62 : vector<24x24xf32>
    %64 = math.exp %63 : vector<24x24xf32>
    %cst_34 = arith.constant dense<0.000000e+00> : vector<24xf32>
    %65 = vector.multi_reduction <add>, %64, %cst_34 [1] : vector<24x24xf32> to vector<24xf32>
    %66 = vector.shape_cast %65 : vector<24xf32> to vector<24x1xf32>
    %67 = tpu.reciprocal %66 {approx = true} : vector<24x1xf32> -> vector<24x1xf32>
    %68 = vector.broadcast %67 : vector<24x1xf32> to vector<24x24xf32>
    %69 = arith.mulf %64, %68 : vector<24x24xf32>
    %70 = arith.truncf %69 : vector<24x24xf32> to vector<24x24xbf16>
    %cst_35 = arith.constant dense<0.000000e+00> : vector<24x8xf32>
    %71 = tpu.matmul %70, %55, %cst_35 {dimension_numbers = #tpu.dot_dimension_numbers<[1], [0], [0], [1], [0, 0, 1, 1], [], []>} : vector<24x24xbf16>, vector<24x8xbf16>, vector<24x8xf32> -> vector<24x8xf32>
    %72 = vector.extract_strided_slice %27 {offsets = [0, 16], sizes = [24, 8], strides = [1, 1]} : vector<24x32xbf16> to vector<24x8xbf16>
    %73 = vector.extract_strided_slice %28 {offsets = [0, 16], sizes = [24, 8], strides = [1, 1]} : vector<24x32xbf16> to vector<24x8xbf16>
    %74 = vector.extract_strided_slice %29 {offsets = [0, 16], sizes = [24, 8], strides = [1, 1]} : vector<24x32xbf16> to vector<24x8xbf16>
    %cst_36 = arith.constant dense<0.000000e+00> : vector<24x24xf32>
    %75 = tpu.matmul %72, %73, %cst_36 {dimension_numbers = #tpu.dot_dimension_numbers<[1], [1], [0], [0], [0, 0, 1, 0], [], []>} : vector<24x8xbf16>, vector<24x8xbf16>, vector<24x24xf32> -> vector<24x24xf32>
    %cst_37 = arith.constant 0.353553385 : f32
    %76 = vector.broadcast %cst_37 : f32 to vector<24x24xf32>
    %77 = arith.mulf %75, %76 : vector<24x24xf32>
    %78 = arith.addf %77, %33 : vector<24x24xf32>
    %cst_38 = arith.constant dense<0xFF800000> : vector<24xf32>
    %79 = vector.multi_reduction <maximumf>, %78, %cst_38 [1] : vector<24x24xf32> to vector<24xf32>
    %80 = vector.shape_cast %79 : vector<24xf32> to vector<24x1xf32>
    %81 = vector.broadcast %80 : vector<24x1xf32> to vector<24x24xf32>
    %82 = arith.subf %78, %81 : vector<24x24xf32>
    %83 = math.exp %82 : vector<24x24xf32>
    %cst_39 = arith.constant dense<0.000000e+00> : vector<24xf32>
    %84 = vector.multi_reduction <add>, %83, %cst_39 [1] : vector<24x24xf32> to vector<24xf32>
    %85 = vector.shape_cast %84 : vector<24xf32> to vector<24x1xf32>
    %86 = tpu.reciprocal %85 {approx = true} : vector<24x1xf32> -> vector<24x1xf32>
    %87 = vector.broadcast %86 : vector<24x1xf32> to vector<24x24xf32>
    %88 = arith.mulf %83, %87 : vector<24x24xf32>
    %89 = arith.truncf %88 : vector<24x24xf32> to vector<24x24xbf16>
    %cst_40 = arith.constant dense<0.000000e+00> : vector<24x8xf32>
    %90 = tpu.matmul %89, %74, %cst_40 {dimension_numbers = #tpu.dot_dimension_numbers<[1], [0], [0], [1], [0, 0, 1, 1], [], []>} : vector<24x24xbf16>, vector<24x8xbf16>, vector<24x8xf32> -> vector<24x8xf32>
    %91 = vector.extract_strided_slice %27 {offsets = [0, 24], sizes = [24, 8], strides = [1, 1]} : vector<24x32xbf16> to vector<24x8xbf16>
    %92 = vector.extract_strided_slice %28 {offsets = [0, 24], sizes = [24, 8], strides = [1, 1]} : vector<24x32xbf16> to vector<24x8xbf16>
    %93 = vector.extract_strided_slice %29 {offsets = [0, 24], sizes = [24, 8], strides = [1, 1]} : vector<24x32xbf16> to vector<24x8xbf16>
    %cst_41 = arith.constant dense<0.000000e+00> : vector<24x24xf32>
    %94 = tpu.matmul %91, %92, %cst_41 {dimension_numbers = #tpu.dot_dimension_numbers<[1], [1], [0], [0], [0, 0, 1, 0], [], []>} : vector<24x8xbf16>, vector<24x8xbf16>, vector<24x24xf32> -> vector<24x24xf32>
    %cst_42 = arith.constant 0.353553385 : f32
    %95 = vector.broadcast %cst_42 : f32 to vector<24x24xf32>
    %96 = arith.mulf %94, %95 : vector<24x24xf32>
    %97 = arith.addf %96, %33 : vector<24x24xf32>
    %cst_43 = arith.constant dense<0xFF800000> : vector<24xf32>
    %98 = vector.multi_reduction <maximumf>, %97, %cst_43 [1] : vector<24x24xf32> to vector<24xf32>
    %99 = vector.shape_cast %98 : vector<24xf32> to vector<24x1xf32>
    %100 = vector.broadcast %99 : vector<24x1xf32> to vector<24x24xf32>
    %101 = arith.subf %97, %100 : vector<24x24xf32>
    %102 = math.exp %101 : vector<24x24xf32>
    %cst_44 = arith.constant dense<0.000000e+00> : vector<24xf32>
    %103 = vector.multi_reduction <add>, %102, %cst_44 [1] : vector<24x24xf32> to vector<24xf32>
    %104 = vector.shape_cast %103 : vector<24xf32> to vector<24x1xf32>
    %105 = tpu.reciprocal %104 {approx = true} : vector<24x1xf32> -> vector<24x1xf32>
    %106 = vector.broadcast %105 : vector<24x1xf32> to vector<24x24xf32>
    %107 = arith.mulf %102, %106 : vector<24x24xf32>
    %108 = arith.truncf %107 : vector<24x24xf32> to vector<24x24xbf16>
    %cst_45 = arith.constant dense<0.000000e+00> : vector<24x8xf32>
    %109 = tpu.matmul %108, %93, %cst_45 {dimension_numbers = #tpu.dot_dimension_numbers<[1], [0], [0], [1], [0, 0, 1, 1], [], []>} : vector<24x24xbf16>, vector<24x8xbf16>, vector<24x8xf32> -> vector<24x8xf32>
    %110 = tpu.concatenate %52, %71, %90, %109 in 1 : vector<24x8xf32>, vector<24x8xf32>, vector<24x8xf32>, vector<24x8xf32> -> vector<24x32xf32>
    %111 = arith.truncf %110 : vector<24x32xf32> to vector<24x32xbf16>
    %c0_46 = arith.constant 0 : index
    %c0_47 = arith.constant 0 : index
    %c0_48 = arith.constant 0 : index
    %112 = vector.load %arg10[%c0_46, %c0_47, %c0_48] : memref<1x32x32xbf16, #tpu.memory_space<vmem>>, vector<1x32x32xbf16>
    %113 = vector.shape_cast %112 : vector<1x32x32xbf16> to vector<32x32xbf16>
    %cst_49 = arith.constant dense<0.000000e+00> : vector<24x32xf32>
    %114 = tpu.matmul %111, %113, %cst_49 {dimension_numbers = #tpu.dot_dimension_numbers<[1], [0], [0], [1], [0, 0, 1, 1], [], []>} : vector<24x32xbf16>, vector<32x32xbf16>, vector<24x32xf32> -> vector<24x32xf32>
    %c0_50 = arith.constant 0 : index
    %c0_51 = arith.constant 0 : index
    %c0_52 = arith.constant 0 : index
    %115 = vector.load %arg11[%c0_50, %c0_51, %c0_52] : memref<1x1x32xf32, #tpu.memory_space<vmem>>, vector<1x1x32xf32>
    %116 = vector.shape_cast %115 : vector<1x1x32xf32> to vector<1x32xf32>
    %117 = vector.broadcast %116 : vector<1x32xf32> to vector<24x32xf32>
    %118 = arith.addf %114, %117 : vector<24x32xf32>
    %c0_53 = arith.constant 0 : index
    %c0_54 = arith.constant 0 : index
    %c0_55 = arith.constant 0 : index
    %119 = vector.load %arg12[%c0_53, %c0_54, %c0_55] : memref<1x1x32xf32, #tpu.memory_space<vmem>>, vector<1x1x32xf32>
    %120 = vector.shape_cast %119 : vector<1x1x32xf32> to vector<1x32xf32>
    %c0_56 = arith.constant 0 : index
    %c0_57 = arith.constant 0 : index
    %c0_58 = arith.constant 0 : index
    %121 = vector.load %arg13[%c0_56, %c0_57, %c0_58] : memref<1x1x32xf32, #tpu.memory_space<vmem>>, vector<1x1x32xf32>
    %122 = vector.shape_cast %121 : vector<1x1x32xf32> to vector<1x32xf32>
    %123 = arith.addf %4, %118 : vector<24x32xf32>
    %cst_59 = arith.constant dense<0.000000e+00> : vector<24xf32>
    %124 = vector.multi_reduction <add>, %123, %cst_59 [1] : vector<24x32xf32> to vector<24xf32>
    %125 = vector.shape_cast %124 : vector<24xf32> to vector<24x1xf32>
    %cst_60 = arith.constant 3.200000e+01 : f32
    %126 = vector.broadcast %cst_60 : f32 to vector<24x1xf32>
    %127 = arith.divf %125, %126 : vector<24x1xf32>
    %128 = vector.broadcast %127 : vector<24x1xf32> to vector<24x32xf32>
    %129 = arith.subf %123, %128 : vector<24x32xf32>
    %130 = arith.mulf %129, %129 : vector<24x32xf32>
    %cst_61 = arith.constant dense<0.000000e+00> : vector<24xf32>
    %131 = vector.multi_reduction <add>, %130, %cst_61 [1] : vector<24x32xf32> to vector<24xf32>
    %132 = vector.shape_cast %131 : vector<24xf32> to vector<24x1xf32>
    %cst_62 = arith.constant 3.200000e+01 : f32
    %133 = vector.broadcast %cst_62 : f32 to vector<24x1xf32>
    %134 = arith.divf %132, %133 : vector<24x1xf32>
    %135 = vector.broadcast %127 : vector<24x1xf32> to vector<24x32xf32>
    %136 = arith.subf %123, %135 : vector<24x32xf32>
    %cst_63 = arith.constant 9.99999974E-6 : f32
    %137 = vector.broadcast %cst_63 : f32 to vector<24x1xf32>
    %138 = arith.addf %134, %137 : vector<24x1xf32>
    %139 = math.rsqrt %138 : vector<24x1xf32>
    %140 = vector.broadcast %139 : vector<24x1xf32> to vector<24x32xf32>
    %141 = arith.mulf %136, %140 : vector<24x32xf32>
    %142 = vector.broadcast %120 : vector<1x32xf32> to vector<24x32xf32>
    %143 = arith.mulf %141, %142 : vector<24x32xf32>
    %144 = vector.broadcast %122 : vector<1x32xf32> to vector<24x32xf32>
    %145 = arith.addf %143, %144 : vector<24x32xf32>
    %146 = arith.truncf %145 : vector<24x32xf32> to vector<24x32xbf16>
    %c0_64 = arith.constant 0 : index
    %c0_65 = arith.constant 0 : index
    %c0_66 = arith.constant 0 : index
    %147 = vector.load %arg14[%c0_64, %c0_65, %c0_66] : memref<1x32x2048xbf16, #tpu.memory_space<vmem>>, vector<1x32x2048xbf16>
    %148 = vector.shape_cast %147 : vector<1x32x2048xbf16> to vector<32x2048xbf16>
    %cst_67 = arith.constant dense<0.000000e+00> : vector<24x2048xf32>
    %149 = tpu.matmul %146, %148, %cst_67 {dimension_numbers = #tpu.dot_dimension_numbers<[1], [0], [0], [1], [0, 0, 1, 1], [], []>} : vector<24x32xbf16>, vector<32x2048xbf16>, vector<24x2048xf32> -> vector<24x2048xf32>
    %c0_68 = arith.constant 0 : index
    %c0_69 = arith.constant 0 : index
    %c0_70 = arith.constant 0 : index
    %150 = vector.load %arg15[%c0_68, %c0_69, %c0_70] : memref<1x1x2048xf32, #tpu.memory_space<vmem>>, vector<1x1x2048xf32>
    %151 = vector.shape_cast %150 : vector<1x1x2048xf32> to vector<1x2048xf32>
    %152 = vector.broadcast %151 : vector<1x2048xf32> to vector<24x2048xf32>
    %153 = arith.addf %149, %152 : vector<24x2048xf32>
    %cst_71 = arith.constant 0.000000e+00 : f32
    %154 = vector.broadcast %cst_71 : f32 to vector<24x2048xf32>
    %155 = arith.maximumf %153, %154 : vector<24x2048xf32>
    %156 = arith.truncf %155 : vector<24x2048xf32> to vector<24x2048xbf16>
    %c0_72 = arith.constant 0 : index
    %c0_73 = arith.constant 0 : index
    %c0_74 = arith.constant 0 : index
    %157 = vector.load %arg16[%c0_72, %c0_73, %c0_74] : memref<1x2048x32xbf16, #tpu.memory_space<vmem>>, vector<1x2048x32xbf16>
    %158 = vector.shape_cast %157 : vector<1x2048x32xbf16> to vector<2048x32xbf16>
    %cst_75 = arith.constant dense<0.000000e+00> : vector<24x32xf32>
    %159 = tpu.matmul %156, %158, %cst_75 {dimension_numbers = #tpu.dot_dimension_numbers<[1], [0], [0], [1], [0, 0, 1, 1], [], []>} : vector<24x2048xbf16>, vector<2048x32xbf16>, vector<24x32xf32> -> vector<24x32xf32>
    %c0_76 = arith.constant 0 : index
    %c0_77 = arith.constant 0 : index
    %c0_78 = arith.constant 0 : index
    %160 = vector.load %arg17[%c0_76, %c0_77, %c0_78] : memref<1x1x32xf32, #tpu.memory_space<vmem>>, vector<1x1x32xf32>
    %161 = vector.shape_cast %160 : vector<1x1x32xf32> to vector<1x32xf32>
    %162 = vector.broadcast %161 : vector<1x32xf32> to vector<24x32xf32>
    %163 = arith.addf %159, %162 : vector<24x32xf32>
    %c0_79 = arith.constant 0 : index
    %c0_80 = arith.constant 0 : index
    %c0_81 = arith.constant 0 : index
    %164 = vector.load %arg18[%c0_79, %c0_80, %c0_81] : memref<1x1x32xf32, #tpu.memory_space<vmem>>, vector<1x1x32xf32>
    %165 = vector.shape_cast %164 : vector<1x1x32xf32> to vector<1x32xf32>
    %c0_82 = arith.constant 0 : index
    %c0_83 = arith.constant 0 : index
    %c0_84 = arith.constant 0 : index
    %166 = vector.load %arg19[%c0_82, %c0_83, %c0_84] : memref<1x1x32xf32, #tpu.memory_space<vmem>>, vector<1x1x32xf32>
    %167 = vector.shape_cast %166 : vector<1x1x32xf32> to vector<1x32xf32>
    %168 = arith.addf %145, %163 : vector<24x32xf32>
    %cst_85 = arith.constant dense<0.000000e+00> : vector<24xf32>
    %169 = vector.multi_reduction <add>, %168, %cst_85 [1] : vector<24x32xf32> to vector<24xf32>
    %170 = vector.shape_cast %169 : vector<24xf32> to vector<24x1xf32>
    %cst_86 = arith.constant 3.200000e+01 : f32
    %171 = vector.broadcast %cst_86 : f32 to vector<24x1xf32>
    %172 = arith.divf %170, %171 : vector<24x1xf32>
    %173 = vector.broadcast %172 : vector<24x1xf32> to vector<24x32xf32>
    %174 = arith.subf %168, %173 : vector<24x32xf32>
    %175 = arith.mulf %174, %174 : vector<24x32xf32>
    %cst_87 = arith.constant dense<0.000000e+00> : vector<24xf32>
    %176 = vector.multi_reduction <add>, %175, %cst_87 [1] : vector<24x32xf32> to vector<24xf32>
    %177 = vector.shape_cast %176 : vector<24xf32> to vector<24x1xf32>
    %cst_88 = arith.constant 3.200000e+01 : f32
    %178 = vector.broadcast %cst_88 : f32 to vector<24x1xf32>
    %179 = arith.divf %177, %178 : vector<24x1xf32>
    %180 = vector.broadcast %172 : vector<24x1xf32> to vector<24x32xf32>
    %181 = arith.subf %168, %180 : vector<24x32xf32>
    %cst_89 = arith.constant 9.99999974E-6 : f32
    %182 = vector.broadcast %cst_89 : f32 to vector<24x1xf32>
    %183 = arith.addf %179, %182 : vector<24x1xf32>
    %184 = math.rsqrt %183 : vector<24x1xf32>
    %185 = vector.broadcast %184 : vector<24x1xf32> to vector<24x32xf32>
    %186 = arith.mulf %181, %185 : vector<24x32xf32>
    %187 = vector.broadcast %165 : vector<1x32xf32> to vector<24x32xf32>
    %188 = arith.mulf %186, %187 : vector<24x32xf32>
    %189 = vector.broadcast %167 : vector<1x32xf32> to vector<24x32xf32>
    %190 = arith.addf %188, %189 : vector<24x32xf32>
    %191 = vector.shape_cast %190 : vector<24x32xf32> to vector<1x24x32xf32>
    %c0_90 = arith.constant 0 : index
    %c0_91 = arith.constant 0 : index
    %c0_92 = arith.constant 0 : index
    %192 = vector.load %arg20[%c0_90, %c0_91, %c0_92] : memref<1x24x32xf32, #tpu.memory_space<vmem>>, vector<1x24x32xf32>
    tpu.vector_store %arg20[%c0_90, %c0_91, %c0_92], %191 {strides = array<i32>} : memref<1x24x32xf32, #tpu.memory_space<vmem>>, vector<1x24x32xf32>,
    return
  }
  func.func @transform_0(%arg0: i32, %arg1: i32) -> (i32, i32, i32) {
    %c0_i32 = arith.constant 0 : i32
    %c0_i32_0 = arith.constant 0 : i32
    %c0_i32_1 = arith.constant 0 : i32
    return %arg0, %c0_i32, %c0_i32_0 : i32, i32, i32
  }
  func.func @transform_1(%arg0: i32, %arg1: i32) -> (i32, i32, i32) {
    %c0_i32 = arith.constant 0 : i32
    %c0_i32_0 = arith.constant 0 : i32
    %c0_i32_1 = arith.constant 0 : i32
    return %arg0, %c0_i32, %c0_i32_0 : i32, i32, i32
  }
  func.func @transform_2(%arg0: i32, %arg1: i32) -> (i32, i32, i32) {
    %c0_i32 = arith.constant 0 : i32
    %c0_i32_0 = arith.constant 0 : i32
    %c0_i32_1 = arith.constant 0 : i32
    return %arg1, %c0_i32, %c0_i32_0 : i32, i32, i32
  }
  func.func @transform_3(%arg0: i32, %arg1: i32) -> (i32, i32, i32) {
    %c0_i32 = arith.constant 0 : i32
    %c0_i32_0 = arith.constant 0 : i32
    %c0_i32_1 = arith.constant 0 : i32
    return %arg1, %c0_i32, %c0_i32_0 : i32, i32, i32
  }
  func.func @transform_4(%arg0: i32, %arg1: i32) -> (i32, i32, i32) {
    %c0_i32 = arith.constant 0 : i32
    %c0_i32_0 = arith.constant 0 : i32
    %c0_i32_1 = arith.constant 0 : i32
    return %arg1, %c0_i32, %c0_i32_0 : i32, i32, i32
  }
  func.func @transform_5(%arg0: i32, %arg1: i32) -> (i32, i32, i32) {
    %c0_i32 = arith.constant 0 : i32
    %c0_i32_0 = arith.constant 0 : i32
    %c0_i32_1 = arith.constant 0 : i32
    return %arg1, %c0_i32, %c0_i32_0 : i32, i32, i32
  }
  func.func @transform_6(%arg0: i32, %arg1: i32) -> (i32, i32, i32) {
    %c0_i32 = arith.constant 0 : i32
    %c0_i32_0 = arith.constant 0 : i32
    %c0_i32_1 = arith.constant 0 : i32
    return %arg1, %c0_i32, %c0_i32_0 : i32, i32, i32
  }
  func.func @transform_7(%arg0: i32, %arg1: i32) -> (i32, i32, i32) {
    %c0_i32 = arith.constant 0 : i32
    %c0_i32_0 = arith.constant 0 : i32
    %c0_i32_1 = arith.constant 0 : i32
    return %arg1, %c0_i32, %c0_i32_0 : i32, i32, i32
  }
  func.func @transform_8(%arg0: i32, %arg1: i32) -> (i32, i32, i32) {
    %c0_i32 = arith.constant 0 : i32
    %c0_i32_0 = arith.constant 0 : i32
    %c0_i32_1 = arith.constant 0 : i32
    return %arg1, %c0_i32, %c0_i32_0 : i32, i32, i32
  }
  func.func @transform_9(%arg0: i32, %arg1: i32) -> (i32, i32, i32) {
    %c0_i32 = arith.constant 0 : i32
    %c0_i32_0 = arith.constant 0 : i32
    %c0_i32_1 = arith.constant 0 : i32
    return %arg1, %c0_i32, %c0_i32_0 : i32, i32, i32
  }
  func.func @transform_10(%arg0: i32, %arg1: i32) -> (i32, i32, i32) {
    %c0_i32 = arith.constant 0 : i32
    %c0_i32_0 = arith.constant 0 : i32
    %c0_i32_1 = arith.constant 0 : i32
    return %arg1, %c0_i32, %c0_i32_0 : i32, i32, i32
  }
  func.func @transform_11(%arg0: i32, %arg1: i32) -> (i32, i32, i32) {
    %c0_i32 = arith.constant 0 : i32
    %c0_i32_0 = arith.constant 0 : i32
    %c0_i32_1 = arith.constant 0 : i32
    return %arg1, %c0_i32, %c0_i32_0 : i32, i32, i32
  }
  func.func @transform_12(%arg0: i32, %arg1: i32) -> (i32, i32, i32) {
    %c0_i32 = arith.constant 0 : i32
    %c0_i32_0 = arith.constant 0 : i32
    %c0_i32_1 = arith.constant 0 : i32
    return %arg1, %c0_i32, %c0_i32_0 : i32, i32, i32
  }
  func.func @transform_13(%arg0: i32, %arg1: i32) -> (i32, i32, i32) {
    %c0_i32 = arith.constant 0 : i32
    %c0_i32_0 = arith.constant 0 : i32
    %c0_i32_1 = arith.constant 0 : i32
    return %arg1, %c0_i32, %c0_i32_0 : i32, i32, i32
  }
  func.func @transform_14(%arg0: i32, %arg1: i32) -> (i32, i32, i32) {
    %c0_i32 = arith.constant 0 : i32
    %c0_i32_0 = arith.constant 0 : i32
    %c0_i32_1 = arith.constant 0 : i32
    return %arg1, %c0_i32, %c0_i32_0 : i32, i32, i32
  }
  func.func @transform_15(%arg0: i32, %arg1: i32) -> (i32, i32, i32) {
    %c0_i32 = arith.constant 0 : i32
    %c0_i32_0 = arith.constant 0 : i32
    %c0_i32_1 = arith.constant 0 : i32
    return %arg1, %c0_i32, %c0_i32_0 : i32, i32, i32
  }
  func.func @transform_16(%arg0: i32, %arg1: i32) -> (i32, i32, i32) {
    %c0_i32 = arith.constant 0 : i32
    %c0_i32_0 = arith.constant 0 : i32
    %c0_i32_1 = arith.constant 0 : i32
    return %arg1, %c0_i32, %c0_i32_0 : i32, i32, i32
  }
  func.func @transform_17(%arg0: i32, %arg1: i32) -> (i32, i32, i32) {
    %c0_i32 = arith.constant 0 : i32
    %c0_i32_0 = arith.constant 0 : i32
    %c0_i32_1 = arith.constant 0 : i32
    return %arg1, %c0_i32, %c0_i32_0 : i32, i32, i32
  }
  func.func @transform_18(%arg0: i32, %arg1: i32) -> (i32, i32, i32) {
    %c0_i32 = arith.constant 0 : i32
    %c0_i32_0 = arith.constant 0 : i32
    %c0_i32_1 = arith.constant 0 : i32
    return %arg0, %c0_i32, %c0_i32_0 : i32, i32, i32
  }
}

</mosaic_0001>

<bundles_post_ra>
// kernel: tpu_custom_call.1
= control target key start
LH: loop header
LB: loop body
LE: loop exit
PB: predicated region body
PF: predicated region fallthrough
CT: control target
= control target key end

     0   :  { %s6509_s0 = inlined_call_operand.vmem [shape: f32[2,24,32], index: 0, kind: input, shape index: {}]   ;;  %s6510_s1 = inlined_call_operand.vmem [shape: f32[2,1,24], index: 1, kind: input, shape index: {}]   ;;  %s6511_s2 = inlined_call_operand.vmem [shape: bf16[2,32,32], index: 2, kind: input, shape index: {}]   ;;  %s6512_s3 = inlined_call_operand.vmem [shape: bf16[2,32,32], index: 3, kind: input, shape index: {}]   ;;  %s6513_s4 = inlined_call_operand.vmem [shape: bf16[2,32,32], index: 4, kind: input, shape index: {}]   ;;  %s6514_s5 = inlined_call_operand.vmem [shape: f32[2,1,32], index: 5, kind: input, shape index: {}]   ;;  %s6515_s6 = inlined_call_operand.vmem [shape: f32[2,1,32], index: 6, kind: input, shape index: {}]   ;;  %s6516_s7 = inlined_call_operand.vmem [shape: f32[2,1,32], index: 7, kind: input, shape index: {}]   ;;  %s6517_s8 = inlined_call_operand.vmem [shape: bf16[2,32,32], index: 8, kind: input, shape index: {}]   ;;  %s6518_s9 = inlined_call_operand.vmem [shape: f32[2,1,32], index: 9, kind: input, shape index: {}]   ;;  %s6519_s10 = inlined_call_operand.vmem [shape: f32[2,1,32], index: 10, kind: input, shape index: {}]   ;;  %s6520_s11 = inlined_call_operand.vmem [shape: f32[2,1,32], index: 11, kind: input, shape index: {}]   ;;  %s6521_s12 = inlined_call_operand.vmem [shape: bf16[2,32,2048], index: 12, kind: input, shape index: {}]   ;;  %s6522_s13 = inlined_call_operand.vmem [shape: f32[2,1,2048], index: 13, kind: input, shape index: {}]   ;;  %s6523_s14 = inlined_call_operand.vmem [shape: bf16[2,2048,32], index: 14, kind: input, shape index: {}]   ;;  %s6524_s15 = inlined_call_operand.vmem [shape: f32[2,1,32], index: 15, kind: input, shape index: {}]   ;;  %s6525_s16 = inlined_call_operand.vmem [shape: f32[2,1,32], index: 16, kind: input, shape index: {}]   ;;  %s6526_s17 = inlined_call_operand.vmem [shape: f32[2,1,32], index: 17, kind: input, shape index: {}]   ;;  %s6527_s18 = inlined_call_operand.hbm [shape: f32[2,24,32], index: 18, kind: output, shape index: {}]  }
   0x1   :  { %6545 = sst [smem:[#allocation20_spill]] %s6509_s0 }
   0x2   :  { %6546 = sst [smem:[#allocation21_spill]] %s6510_s1 }
   0x3   :  { %6547 = sst [smem:[#allocation22_spill]] %s6511_s2 }
   0x4   :  { %6548 = sst [smem:[#allocation23_spill]] %s6512_s3 }
   0x5   :  { %6549 = sst [smem:[#allocation24_spill]] %s6513_s4 }
   0x6   :  { %6550 = sst [smem:[#allocation25_spill]] %s6514_s5 }
   0x7   :  { %6551 = sst [smem:[#allocation26_spill]] %s6517_s8 }
   0x8   :  { %6552 = sst [smem:[#allocation27_spill]] %s6519_s10 }
   0x9   :  { %6553 = sst [smem:[#allocation28_spill]] %s6520_s11 }
   0xa   :  { %6554 = sst [smem:[#allocation29_spill]] %s6521_s12 }
   0xb   :  { %6555 = sst [smem:[#allocation30_spill]] %s6523_s14 }
   0xc   :  { %6556 = sst [smem:[#allocation31_spill]] %s6525_s16 }
   0xd   :  { %6557 = sst [smem:[#allocation32_spill]] %s6526_s17 }
   0xe   :  { %6558 = sst [smem:[#allocation33_spill]] %s6527_s18 }
   0xf   :  { %23 = vsyncpa [#allocation3], 0 }
  0x10   :  { %25 = vsyncpa [#allocation3 + $0x1], 0  ;;  %s5617_s27 = smov 0   ;;  %s5619_s28 = smov 0  }
  0x11   :  { %s5621_s29 = smov 0   ;;  %s5623_s30 = smov 0  }
  0x12   :  { %s5625_s0 = smov 0   ;;  %s5627_s19 = smov 0  }
  0x13   :  { %s5629_s1 = smov 0   ;;  %s5631_s20 = smov 0  }
  0x14 LB: > { %6559 = sst [smem:[#allocation5_spill]] %s5483_s27  ;;  %s4494_s21 = sadd.s32 4294967295, %s5511_s20   ;;  %s5511_s20 = sphi %s5631_s20, %s31_s20   ;;  %s5507_s1 = sphi %s5629_s1, %s6620_s1   ;;  %s5503_s19 = sphi %s5627_s19, %s6619_s19   ;;  %s5499_s0 = sphi %s5625_s0, %s6618_s0   ;;  %s5495_s30 = sphi %s5623_s30, %s6617_s30   ;;  %s5491_s29 = sphi %s5621_s29, %s6616_s29   ;;  %s5487_s28 = sphi %s5619_s28, %s6615_s28   ;;  %s5483_s27 = sphi %s5617_s27, %s6614_s27  }
  0x15   : > { %6560 = sst [smem:[#allocation6_spill]] %s5487_s28  ;;  %s4495_s22 = sadd.s32 4294967294, %s5511_s20  }
  0x16   : > { %6561 = sst [smem:[#allocation7_spill]] %s5491_s29  ;;  %s40_s2 = sadd.s32 1, %s5503_s19 }
  0x17   : > { %6562 = sst [smem:[#allocation8_spill]] %s5495_s30  ;;  %p41_p0 = scmp.ge.s32.totalorder %s40_s2, 2 }
  0x18   : > { %6563 = sst [smem:[#allocation9_spill]] %s5499_s0  ;;  %s43_s23 = sadd.s32 1, %s5507_s1 }
  0x19   : > { %6564 = sst [smem:[#allocation10_spill]] %s5503_s19  ;;  %p528_p1 = scmp.ne.s32.totalorder %s5491_s29, %s5487_s28 }
  0x1a   : > { %6565 = sst [smem:[#allocation11_spill]] %s5507_s1  ;;  %p529_p2 = scmp.eq.s32.totalorder %s4494_s21, 3 }
  0x1b   : > { %6566 = sst [smem:[#allocation12_spill]] %s5511_s20  ;;  %s6622_s2 = smov (%p41_p0, %s40_s2), 0 }
  0x1c   : > { %6567 = sst [smem:[#allocation13_spill]] %s6622_s2  ;;  %s6624_s23 = smov (!%p41_p0, %s43_s23), %s5507_s1 }
  0x1d   : > { %p5666_p3 = por %p529_p2, %p528_p1  ;;  %p534_p4 = scmp.ne.s32.totalorder %s5487_s28, %s5483_s27 }
  0x1e   : > { %p45_p5 = scmp.ge.s32.totalorder %s6624_s23, 2  ;;  %p535_p6 = scmp.eq.s32.totalorder %s4495_s22, 3 }
  0x1f   : > { %s6568_s24 = scalar_select %p5666_p3, 1, 0 }
  0x20   : > { %p4498_p7 = scmp.ge.s32.totalorder %s5511_s20, 1  ;;  %p676_p8 = scmp.lt.s32.totalorder %s5511_s20, 5 }
  0x21   : > { %6569 = sst [smem:[#allocation14_spill]] %s6568_s24  ;;  %s6626_s23 = smov (%p45_p5, %s6624_s23), 0 }
  0x22   : > { %6570 = sst [smem:[#allocation15_spill]] %s6626_s23  ;;  %p5676_p9 = por %p535_p6, %p534_p4 }
  0x23   : > { %p677_p10 = pnand %p4498_p7, %p676_p8  ;;  %s515_s26 = ssub.s32 %s5507_s1, %s6626_s23 }
  0x24   : > { %s6571_s25 = scalar_select %p5676_p9, 1, 0 }
  0x25   : > { %s518_s21 = sadd.s32 1, %s5491_s29  ;;  %p516_p11 = scmp.eq.s32.totalorder %s515_s26, 0 }
  0x26   : > { %6572 = sst [smem:[#allocation16_spill]] %s6571_s25  ;;  %680 = sbr.rel (%p677_p10) target bundleno = 4270 (0x10ae), region = 92 }
  0x27   : > { %s5684_s2 = scalar_select %p516_p11, %s5491_s29, %s518_s21  }
  0x29   : > { %6573 = sst [smem:[#allocation17_spill]] %s5684_s2 }
  0x2d   : > { %s6537_s22 = sand.u32 1, %s5487_s28   ;;  %p794_p12 = scmp.lt.s32.totalorder %s5499_s0, 1 }
  0x2e   : > { %s5121_s19 = smul.u32 24, %s6537_s22  ;;  %p802_p13 = scmp.lt.s32.totalorder %s5495_s30, 1 }
  0x2f   : > { %s5692_s27 = scalar_select %p794_p12, %s5499_s0, 1 }
  0x30   : > { %s5700_s29 = scalar_select %p802_p13, %s5495_s30, 1 }
  0x31   : > { %6574 = sst [smem:[#allocation18_spill]] %s5692_s27  ;;  %s5122_s23 = smul.u32 24, %s5692_s27 }
  0x32   : > { %s6576_s18 = sld [smem:[#allocation20_spill]]  ;;  %s4735_s24 = sshll.u32 %s5700_s29, 4 }
  0x33   : > { %s6578_s0 = sld [smem:[#allocation22_spill]]  ;;  %s6579_s3 = sld [smem:[#allocation23_spill]] }
  0x34   : > { %s6580_s4 = sld [smem:[#allocation24_spill]]  ;;  %s6582_s8 = sld [smem:[#allocation26_spill]] }
  0x35   : > { %s4739_s28 = sshll.u32 %s5700_s29, 8  ;;  %s6585_s12 = sld [smem:[#allocation29_spill]] }
  0x36   : > { %s4740_s27 = sshll.u32 %s5700_s29, 10  ;;  %s856_s16 = scalar_lea.vmem %s6524_s15, %s5700_s29 }
  0x37   : > { %s6587_s1 = sld [smem:[#allocation31_spill]]  ;;  %s6588_s10 = sld [smem:[#allocation32_spill]] }
  0x38   : > { %s798_s22 = scalar_lea.vmem %s6576_s18, %s5122_s23  ;;  %s6589_s21 = sld [smem:[#allocation8_spill]] }
  0x39   : > { %s5713_s20 = scalar_lea.vmem %s6578_s0, %s4735_s24  ;;  %s811_s30 = scalar_lea.vmem %s6579_s3, %s4735_s24 }
  0x3a   : > { %s5721_s18 = scalar_lea.vmem %s6580_s4, %s4735_s24  ;;  %s5734_s5 = scalar_lea.vmem %s6582_s8, %s4735_s24 }
  0x3b   : > { %6581 = sst [smem:[#allocation19_spill]] %s5721_s18  ;;  %s5752_s2 = scalar_lea.vmem %s6585_s12, %s4739_s28 }
  0x3c   : > { %s5757_s8 = scalar_lea.vmem %s6522_s13, %s4735_s24  ;;  %s6586_s18 = sld [smem:[#allocation30_spill]] }
  0x3d   : > { %s859_s28 = scalar_lea.vmem %s6587_s1, %s5700_s29  ;;  %s862_s0 = scalar_lea.vmem %s6588_s10, %s5700_s29 }
  0x3e   : > { %s5777_s24 = scalar_lea.vmem [#allocation2], %s5121_s19  ;;  %p4513_p0 = scmp.ne.s32.totalorder %s6589_s21, 0 }
  0x3f   : > { %v868_v0 = vld [vmem:[%s798_s22] sm:$0xff] (!%p4513_p0)  ;;  %vm871_vm0 = vcmask (!%p4513_p0), 261120   ;;  %v869_v1 = vld [vmem:[%s798_s22 + $0x8] sm:$0xff] (!%p4513_p0)  ;;  %v870_v2 = vld [vmem:[%s798_s22 + $0x10] sm:$0xff] (!%p4513_p0) }
  0x40   : > { %867 = sbr.rel (%p4513_p0) target bundleno = 71 (0x47), region = 96  ;;  %872 = vst.msk [vmem:[%s5777_s24] sm:$0xff] (!%p4513_p0), %vm871_vm0, %v868_v0  ;;  %873 = vst.msk [vmem:[%s5777_s24 + $0x8] sm:$0xff] (!%p4513_p0), %vm871_vm0, %v869_v1 }
  0x41   : > { %874 = vst.msk [vmem:[%s5777_s24 + $0x10] sm:$0xff] (!%p4513_p0), %vm871_vm0, %v870_v2 }
  0x42   : > { %s5767_s14 = scalar_lea.vmem %s6586_s18, %s4740_s27 }
  0x47 PF: > { %v5218_v3 = vld [vmem:[%s811_s30] sm:$0xff]   ;;  %v5219_v4 = vld [vmem:[%s811_s30 + $0x8] sm:$0xff]   ;;  %vm903_vm1 = vcmask 261120   ;;  %s6590_s10 = scalar_lea.vmem %s6515_s6, %s5700_s29  ;;  %s6591_s30 = sld [smem:[#allocation25_spill]]  ;;  %vm1113_vm2 = vcmask 64512   ;;  %vm1180_vm3 = vcmask 195584  }
  0x48   : > { %5021 = vmatprep.subr.bf16.mxu1 %v5218_v3  ;;  %v875_v5 = vld [vmem:[%s5777_s24] sm:$0xff]  ;;  %v876_v6 = vld [vmem:[%s5777_s24 + $0x8] sm:$0xff]  ;;  %v877_v7 = vld [vmem:[%s5777_s24 + $0x10] sm:$0xff]  ;;  %s6593_s22 = sld [smem:[#allocation19_spill]]  ;;  %s6595_s25 = sld [smem:[#allocation21_spill]]  ;;  %vm1222_vm4 = vcmask 1043456  }
  0x49   : > { %5022 = vmatpush3.bf16.msra.mxu1 %v5218_v3  ;;  %v878_v8 = vpack.c.bf16 %v876_v6, %v875_v5  ;;  %v5220_v9 = vld [vmem:[%s5713_s20] sm:$0xff]   ;;  %v5221_v10 = vld [vmem:[%s5713_s20 + $0x8] sm:$0xff]   ;;  %v879_v11 = vpack.c.bf16 %v877_v7, %v877_v7  ;;  %s6594_s20 = sld [smem:[#allocation18_spill]]  ;;  %s6597_s26 = scalar_lea.vmem %s6516_s7, %s5700_s29  ;;  %vm1832_vm5 = vcmask 130048  }
  0x4a   : > { %5023 = vmatprep.subr.bf16.mxu1 %v5219_v4  ;;  %5013 = vmatprep.subr.bf16.mxu0 %v5220_v9  ;;  %v4519_v13 = vld [vmem:[%s6590_s10] ss:$0 sm:$0xff]  ;;  %s5513_s21 = smov 120   ;;  %s5514_s3 = smov 112  }
  0x4b   : > { %5025 = vmatprep.mubr.msk.bf16.mxu1 %vm903_vm1, %v878_v8  ;;  %5014 = vmatpush3.bf16.msra.mxu0 %v5220_v9  ;;  %v4524_v50 = vld [vmem:[%s6597_s26] ss:$0 sm:$0xff]  ;;  %s5515_s4 = smov 104   ;;  %s5516_s10 = smov 8  }
  0x4c   : > { %5017 = vmatprep.mubr.msk.bf16.mxu0 %vm903_vm1, %v878_v8  ;;  %5015 = vmatprep.subr.bf16.mxu0 %v5221_v10  ;;  %s5517_s11 = smov 16   ;;  %s5518_s12 = smov 24  }
  0x4d   : > { %5024 = vmatpush3.bf16.msra.mxu1 %v5219_v4  ;;  %s6592_s19 = scalar_lea.vmem %s6591_s30, %s5700_s29  ;;  %s6599_s23 = sld [smem:[#allocation27_spill]] }
  0x4e   : > { %v4514_v16 = vld [vmem:[%s6592_s19] ss:$0 sm:$0xff]  ;;  %v5223_v35 = vld [vmem:[%s6593_s22 + $0x8] sm:$0xff]   ;;  %s6598_s19 = scalar_lea.vmem %s6518_s9, %s5700_s29  ;;  %s6601_s18 = sld [smem:[#allocation28_spill]] }
  0x4f   : > { %5016 = vmatpush3.bf16.msra.mxu0 %v5221_v10  ;;  %v5222_v34 = vld [vmem:[%s6593_s22] sm:$0xff]   ;;  %s6596_s17 = scalar_lea.vmem %s6595_s25, %s6594_s20 }
  0x50   : > { %5026 = vmatmul.mubr.msk.bf16.vlgmr.msra.gmra.mrb[0].mxu1 %vm903_vm1, %v879_v11  ;;  %5029 = vmatprep.subr.bf16.mxu0 %v5222_v34  ;;  %v5831_v37 = vld [vmem:[%s6596_s17] ss:$0 sm:$0xff]  ;;  %s5520_s17 = smov [#allocation2]  }
  0x52   : > { %5018 = vmatmul.mubr.msk.bf16.vlgmr.msra.gmra.mrb[0].mxu0 %vm903_vm1, %v879_v11 }
  0x53   : > { %5033 = vmatprep.mubr.msk.bf16.mxu0 %vm903_vm1, %v878_v8  ;;  %5030 = vmatpush3.bf16.msra.mxu0 %v5222_v34  ;;  %s6600_s27 = scalar_lea.vmem %s6599_s23, %s5700_s29 }
  0x54   : > { %5031 = vmatprep.subr.bf16.mxu0 %v5223_v35  ;;  %s6602_s1 = scalar_lea.vmem %s6601_s18, %s5700_s29  ;;  %s5421_s18 = sshll.u32 %s5520_s17, 4  ;;  %s5422_s18 = int_to_ptr.vmem [resolvable:$false] %s5421_s18 }
  0x57   : > { %5032 = vmatpush3.bf16.msra.mxu0 %v5223_v35 }
  0x5a   : > { %5034 = vmatmul.mubr.msk.bf16.vlgmr.msra.gmra.mrb[4].mxu0 %vm903_vm1, %v879_v11 }
 0x123   : > { %v5027_v12 = vpop.f32.mrb[0].mxu1 }
 0x124   : > { %v1015_v14 = vpop.f32.mrb[1].mxu1  ;;  %v1024_v19 = vadd.f32 %v5027_v12, %v4519_v13 }
 0x125   : > { %v5028_v15 = vpop.f32.mrb[2].mxu1  ;;  %v5019_v18 = vpop.f32.mrb[0].mxu0  ;;  %v1016_v20 = vadd.f32 %v4519_v13, %v1015_v14 }
 0x126   : > { %v1018_v17 = vpop.f32.mrb[3].mxu1  ;;  %v944_v22 = vpop.f32.mrb[1].mxu0  ;;  %v5805_v28 = vpack.c.bf16 %v1024_v19, %v1024_v19  ;;  %v953_v32 = vadd.f32 %v5019_v18, %v4514_v16 }
 0x127   : > { %v1019_v21 = vadd.f32 %v4519_v13, %v1018_v17  ;;  %v945_v23 = vadd.f32 %v4514_v16, %v944_v22  ;;  %v5020_v24 = vpop.f32.mrb[2].mxu0 }
 0x128   : > { %v947_v26 = vpop.f32.mrb[3].mxu0  ;;  %v1124_v31 = vsel %vm1113_vm2, %v5805_v28, 0  ;;  %v5819_v33 = vpack.c.bf16 %v953_v32, %v953_v32 }
 0x129   : > { %v5803_v25 = vpack.c.bf16 %v1019_v21, %v1016_v20  ;;  %v948_v27 = vadd.f32 %v4514_v16, %v947_v26 }
 0x12b   : > { %5109 = vmatprep.subr.msk.bf16.mxu1 %vm1113_vm2, %v5803_v25  ;;  %v1121_v29 = vsel %vm1113_vm2, %v5803_v25, 0  ;;  %v5811_v30 = vpack.c.bf16 %v948_v27, %v945_v23 }
 0x12c   : > { %5038 = vmatpush3.bf16.xpose.msra.mxu1 %v1121_v29 }
 0x12d   : > { %5110 = vmatprep.subr.msk.bf16.mxu1 %vm1113_vm2, %v5805_v28  ;;  %5041 = vmatprep.mubr.msk.bf16.mxu1 %vm1113_vm2, %v5811_v30  ;;  %v5035_v51 = vpop.f32.mrb[4].mxu0 }
 0x12e   : > { %v1095_v52 = vadd.f32 %v5035_v51, %v4524_v50  ;;  %v1086_v53 = vpop.f32.mrb[5].mxu0 }
 0x12f   : > { %v1087_v54 = vadd.f32 %v4524_v50, %v1086_v53  ;;  %v5036_v55 = vpop.f32.mrb[6].mxu0 }
 0x130   : > { %v1089_v56 = vpop.f32.mrb[7].mxu0  ;;  %v5851_v10 = vpack.c.bf16 %v1095_v52, %v1095_v52 }
 0x131   : > { %v1090_v57 = vadd.f32 %v4524_v50, %v1089_v56 }
 0x132   : > { %v1224_v11 = vsel %vm1222_vm4, %v5851_v10, 0 }
 0x133   : > { %v5844_v58 = vpack.c.bf16 %v1090_v57, %v1087_v54 }
 0x134   : > { %5040 = vmatpush3.bf16.xpose.msra.mxu1 %v1124_v31 }
 0x135   : > { %5045 = vmatprep.subr.bf16.mxu0 %v5844_v58 }
 0x136   : > { %5046 = vmatpush3.bf16.msra.mxu0 %v5844_v58 }
 0x137   : > { %5111 = vmatprep.subr.msk.bf16.mxu0 %vm1222_vm4, %v5851_v10 }
 0x13a   : > { %5048 = vmatpush3.bf16.msra.mxu0 %v1224_v11 }
 0x13b   : > { %5042 = vmatmul.mubr.msk.bf16.vlgmr.msra.gmra.mrb[4].mxu1 %vm1113_vm2, %v5819_v33 }
 0x20e   : > { %v5043_v36 = vpop.f32.mrb[4].mxu1 }
 0x20f   : > { %v1176_v38 = vmul.f32 0.35355338, %v5043_v36  ;;  %v1160_v39 = vpop.f32.mrb[5].mxu1 }
 0x210   : > { %v1174_v40 = vmul.f32 0.35355338, %v1160_v39  ;;  %v5044_v41 = vpop.f32.mrb[6].mxu1 }
 0x211   : > { %v1163_v42 = vpop.f32.mrb[7].mxu1  ;;  %v1179_v43 = vadd.f32 %v5831_v37, %v1176_v38 }
 0x212   : > { %v1175_v44 = vmul.f32 0.35355338, %v1163_v42  ;;  %v1177_v45 = vadd.f32 %v5831_v37, %v1174_v40 }
 0x213   : > { %v1187_v46 = vsel %vm1180_vm3, %v1179_v43, -inf }
 0x214   : > { %1188 = vmax.xlane.f32.xlu1 %v1187_v46  ;;  %v1181_v47 = vsel %vm1180_vm3, %v1177_v45, -inf  ;;  %v1178_v48 = vadd.f32 %v5831_v37, %v1175_v44 }
 0x215   : > { %1182 = vmax.xlane.f32.xlu0 %v1181_v47 }
 0x216   : > { %v1184_v49 = vsel %vm1180_vm3, %v1178_v48, -inf }
 0x219   : > { %1185 = vmax.xlane.f32.xlu0 %v1184_v49 }
 0x2a1   : > { %v1189_v59 = vpop.xlane.xlu1 %1188 }
 0x2a2   : > { %v1192_v60 = vsub.f32 %v1179_v43, %v1189_v59  ;;  %v1183_v61 = vpop.xlane.xlu0 %1182 }
 0x2a3   : > { %v1190_v62 = vsub.f32 %v1177_v45, %v1183_v61 }
 0x2a4   : > { %v1197_v63 = vmul.f32 1.442695, %v1192_v60 }
 0x2a5   : > { %v1193_v0 = vmul.f32 1.442695, %v1190_v62 }
 0x2a6   : > { %v1186_v1 = vpop.xlane.xlu0 %1185 }
 0x2a7   : > { %5354 = vpow2.f32 %v1193_v0  ;;  %v1191_v2 = vsub.f32 %v1178_v48, %v1186_v1 }
 0x2a8   : > { %5356 = vpow2.f32 %v1197_v63 }
 0x2a9   : > { %v1195_v3 = vmul.f32 1.442695, %v1191_v2 }
 0x2ab   : > { %5358 = vpow2.f32 %v1195_v3 }
 0x2b1   : > { %v5355_v4 = vpop.eup %5354 }
 0x2b2   : > { %v1199_v5 = vsel %vm1180_vm3, %v5355_v4, 0.0  ;;  %v5357_v6 = vpop.eup %5356 }
 0x2b3   : > { %1200 = vadd.xlane.f32.xlu1 %v1199_v5  ;;  %v1205_v8 = vsel %vm1180_vm3, %v5357_v6, 0.0 }
 0x2b5   : > { %v5359_v7 = vpop.eup %5358 }
 0x2b6   : > { %v1202_v9 = vsel %vm1180_vm3, %v5359_v7, 0.0 }
 0x2b7   : > { %1206 = vadd.xlane.f32.xlu1 %v1205_v8  ;;  %1203 = vadd.xlane.f32.xlu0 %v1202_v9 }
 0x2c8   : > { %1284 = vrot.lane.b32.xlu1 %v5805_v28, %s5513_s21 }
 0x2cc   : > { %1276 = vrot.lane.b32.xlu1 %v5811_v30, %s5513_s21 }
 0x2cd   : > { %1282 = vrot.lane.b32.xlu0 %v5803_v25, %s5513_s21 }
 0x2d0   : > { %1278 = vrot.lane.b32.xlu1 %v5819_v33, %s5513_s21 }
 0x340   : > { %v1201_v12 = vpop.xlane.xlu1 %1200 }
 0x341   : > { %5360 = vrcp.f32 %v1201_v12 }
 0x344   : > { %v1207_v13 = vpop.xlane.xlu1 %1206  ;;  %v1204_v14 = vpop.xlane.xlu0 %1203 }
 0x345   : > { %5362 = vrcp.f32 %v1207_v13 }
 0x346   : > { %5364 = vrcp.f32 %v1204_v14 }
 0x348   : > { %v1283_v15 = vpop.permute.xlu0 %1282  ;;  %v1285_v20 = vpop.permute.xlu1 %1284 }
 0x349   : > { %5112 = vmatprep.subr.msk.bf16.mxu0 %vm1113_vm2, %v1283_v15  ;;  %v1293_v26 = vsel %vm1113_vm2, %v1283_v15, 0  ;;  %v1296_v29 = vsel %vm1113_vm2, %v1285_v20, 0 }
 0x34b   : > { %v5361_v16 = vpop.eup %5360 }
 0x34c   : > { %v1211_v21 = vmul.f32 %v5361_v16, %v5355_v4  ;;  %v1277_v27 = vpop.permute.xlu1 %1276 }
 0x34f   : > { %v5363_v17 = vpop.eup %5362 }
 0x350   : > { %v5365_v18 = vpop.eup %5364  ;;  %v1213_v19 = vmul.f32 %v5363_v17, %v5357_v6  ;;  %v1279_v31 = vpop.permute.xlu1 %1278 }
 0x351   : > { %v1212_v22 = vmul.f32 %v5365_v18, %v5359_v7 }
 0x352   : > { %v1215_v23 = vpack.c.bf16 %v1213_v19, %v1213_v19 }
 0x353   : > { %v1214_v24 = vpack.c.bf16 %v1212_v22, %v1211_v21 }
 0x355   : > { %5049 = vmatprep.mubr.msk.bf16.mxu0 %vm1180_vm3, %v1214_v24 }
 0x356   : > { %5050 = vmatmul.mubr.msk.bf16.vlgmr.msra.gmra.mrb[8].mxu0 %vm1180_vm3, %v1215_v23 }
 0x357   : > { %5054 = vmatpush3.bf16.xpose.msra.mxu0 %v1293_v26  ;;  %5057 = vmatprep.mubr.msk.bf16.mxu0 %vm1113_vm2, %v1277_v27 }
 0x358   : > { %5113 = vmatprep.subr.msk.bf16.mxu0 %vm1113_vm2, %v1285_v20 }
 0x35f   : > { %5056 = vmatpush3.bf16.xpose.msra.mxu0 %v1296_v29 }
 0x366   : > { %5058 = vmatmul.mubr.msk.bf16.vlgmr.msra.gmra.mrb[12].mxu0 %vm1113_vm2, %v1279_v31 }
 0x429   : > { %v5873_v32 = vpop.f32.mrb[8].mxu0 }
 0x42a   : > { %v5875_v34 = vpop.f32.mrb[9].mxu0 }
 0x42b   : > { %v5052_v35 = vpop.f32.mrb[10].mxu0 }
 0x42c   : > { %v5877_v36 = vpop.f32.mrb[11].mxu0 }
 0x439   : > { %v5059_v38 = vpop.f32.mrb[12].mxu0 }
 0x43a   : > { %v1332_v39 = vpop.f32.mrb[13].mxu0  ;;  %v1348_v40 = vmul.f32 0.35355338, %v5059_v38 }
 0x43b   : > { %v1346_v41 = vmul.f32 0.35355338, %v1332_v39  ;;  %v5060_v42 = vpop.f32.mrb[14].mxu0 }
 0x43c   : > { %v1335_v43 = vpop.f32.mrb[15].mxu0  ;;  %v1351_v48 = vadd.f32 %v5831_v37, %v1348_v40 }
 0x43d   : > { %v1347_v44 = vmul.f32 0.35355338, %v1335_v43  ;;  %v1349_v45 = vadd.f32 %v5831_v37, %v1346_v41 }
 0x43e   : > { %v1358_v50 = vsel %vm1180_vm3, %v1351_v48, -inf }
 0x43f   : > { %v1352_v46 = vsel %vm1180_vm3, %v1349_v45, -inf  ;;  %v1350_v47 = vadd.f32 %v5831_v37, %v1347_v44 }
 0x440   : > { %1353 = vmax.xlane.f32.xlu0 %v1352_v46 }
 0x441   : > { %v1355_v49 = vsel %vm1180_vm3, %v1350_v47, -inf }
 0x442   : > { %1356 = vmax.xlane.f32.xlu1 %v1355_v49 }
 0x444   : > { %1359 = vmax.xlane.f32.xlu0 %v1358_v50 }
 0x4cd   : > { %v1354_v51 = vpop.xlane.xlu0 %1353 }
 0x4ce   : > { %v1361_v52 = vsub.f32 %v1349_v45, %v1354_v51 }
 0x4cf   : > { %v1357_v53 = vpop.xlane.xlu1 %1356 }
 0x4d0   : > { %v1364_v54 = vmul.f32 1.442695, %v1361_v52  ;;  %v1362_v55 = vsub.f32 %v1350_v47, %v1357_v53 }
 0x4d1   : > { %v1360_v56 = vpop.xlane.xlu0 %1359 }
 0x4d2   : > { %5366 = vpow2.f32 %v1364_v54  ;;  %v1366_v57 = vmul.f32 1.442695, %v1362_v55  ;;  %v1363_v59 = vsub.f32 %v1351_v48, %v1360_v56 }
 0x4d4   : > { %5368 = vpow2.f32 %v1366_v57  ;;  %v1368_v60 = vmul.f32 1.442695, %v1363_v59 }
 0x4d6   : > { %5370 = vpow2.f32 %v1368_v60 }
 0x4dc   : > { %v5367_v61 = vpop.eup %5366 }
 0x4dd   : > { %v1370_v62 = vsel %vm1180_vm3, %v5367_v61, 0.0 }
 0x4de   : > { %v5369_v63 = vpop.eup %5368  ;;  %1371 = vadd.xlane.f32.xlu0 %v1370_v62 }
 0x4df   : > { %v1373_v2 = vsel %vm1180_vm3, %v5369_v63, 0.0 }
 0x4e0   : > { %v5371_v0 = vpop.eup %5370 }
 0x4e1   : > { %v1376_v1 = vsel %vm1180_vm3, %v5371_v0, 0.0 }
 0x4e2   : > { %1377 = vadd.xlane.f32.xlu1 %v1376_v1  ;;  %1374 = vadd.xlane.f32.xlu0 %v1373_v2 }
 0x4f3   : > { %1391 = vrot.lane.b32.xlu1 %v5851_v10, %s5513_s21 }
 0x4f7   : > { %1455 = vrot.lane.b32.xlu1 %v5803_v25, %s5514_s3 }
 0x4f8   : > { %1389 = vrot.lane.b32.xlu0 %v5844_v58, %s5513_s21 }
 0x4fb   : > { %1457 = vrot.lane.b32.xlu1 %v5805_v28, %s5514_s3 }
 0x4fc   : > { %1451 = vrot.lane.b32.xlu0 %v5811_v30, %s5514_s3 }
 0x4ff   : > { %1453 = vrot.lane.b32.xlu1 %v5819_v33, %s5514_s3 }
 0x56b   : > { %v1372_v3 = vpop.xlane.xlu0 %1371 }
 0x56c   : > { %5372 = vrcp.f32 %v1372_v3 }
 0x56f   : > { %v1375_v4 = vpop.xlane.xlu0 %1374  ;;  %v1378_v5 = vpop.xlane.xlu1 %1377 }
 0x570   : > { %5374 = vrcp.f32 %v1375_v4 }
 0x571   : > { %5376 = vrcp.f32 %v1378_v5 }
 0x573   : > { %v1390_v6 = vpop.permute.xlu0 %1389  ;;  %v1392_v7 = vpop.permute.xlu1 %1391 }
 0x574   : > { %5061 = vmatprep.subr.bf16.mxu1 %v1390_v6  ;;  %v1401_v9 = vsel %vm1222_vm4, %v1392_v7, 0 }
 0x575   : > { %5062 = vmatpush3.bf16.msra.mxu1 %v1390_v6 }
 0x576   : > { %5114 = vmatprep.subr.msk.bf16.mxu1 %vm1222_vm4, %v1392_v7  ;;  %v5373_v8 = vpop.eup %5372 }
 0x577   : > { %v1456_v11 = vpop.permute.xlu1 %1455  ;;  %v1382_v14 = vmul.f32 %v5373_v8, %v5367_v61  ;;  %v1452_v19 = vpop.permute.xlu0 %1451 }
 0x578   : > { %v1466_v20 = vsel %vm1113_vm2, %v1456_v11, 0 }
 0x579   : > { %5064 = vmatpush3.bf16.msra.mxu1 %v1401_v9 }
 0x57a   : > { %v5375_v12 = vpop.eup %5374  ;;  %5115 = vmatprep.subr.msk.bf16.mxu1 %vm1113_vm2, %v1456_v11 }
 0x57b   : > { %v5377_v13 = vpop.eup %5376  ;;  %v1383_v15 = vmul.f32 %v5375_v12, %v5369_v63  ;;  %v1458_v21 = vpop.permute.xlu1 %1457 }
 0x57c   : > { %v1384_v16 = vmul.f32 %v5377_v13, %v5371_v0  ;;  %v1469_v22 = vsel %vm1113_vm2, %v1458_v21, 0 }
 0x57d   : > { %v1385_v17 = vpack.c.bf16 %v1383_v15, %v1382_v14 }
 0x57e   : > { %v1386_v18 = vpack.c.bf16 %v1384_v16, %v1384_v16 }
 0x57f   : > { %5065 = vmatprep.mubr.msk.bf16.mxu1 %vm1180_vm3, %v1385_v17  ;;  %v1454_v23 = vpop.permute.xlu1 %1453 }
 0x580   : > { %5066 = vmatmul.mubr.msk.bf16.vlgmr.msra.gmra.mrb[8].mxu1 %vm1180_vm3, %v1386_v18 }
 0x581   : > { %5073 = vmatprep.mubr.msk.bf16.mxu1 %vm1113_vm2, %v1452_v19 }
 0x582   : > { %5070 = vmatpush3.bf16.xpose.msra.mxu1 %v1466_v20 }
 0x583   : > { %5116 = vmatprep.subr.msk.bf16.mxu1 %vm1113_vm2, %v1458_v21 }
 0x58a   : > { %5072 = vmatpush3.bf16.xpose.msra.mxu1 %v1469_v22 }
 0x591   : > { %5074 = vmatmul.mubr.msk.bf16.vlgmr.msra.gmra.mrb[12].mxu1 %vm1113_vm2, %v1454_v23 }
 0x653   : > { %v5910_v24 = vpop.f32.mrb[8].mxu1 }
 0x654   : > { %v5912_v26 = vpop.f32.mrb[9].mxu1 }
 0x655   : > { %v5068_v27 = vpop.f32.mrb[10].mxu1 }
 0x656   : > { %v5914_v29 = vpop.f32.mrb[11].mxu1 }
 0x657   : > { %v5203_v31 = vpack.i.bf16 %v5914_v29, %v5912_v26 }
 0x664   : > { %v5075_v35 = vpop.f32.mrb[12].mxu1 }
 0x665   : > { %v1505_v38 = vpop.f32.mrb[13].mxu1  ;;  %v1521_v39 = vmul.f32 0.35355338, %v5075_v35 }
 0x666   : > { %v1519_v40 = vmul.f32 0.35355338, %v1505_v38  ;;  %v5076_v41 = vpop.f32.mrb[14].mxu1 }
 0x667   : > { %v1508_v42 = vpop.f32.mrb[15].mxu1  ;;  %v1524_v47 = vadd.f32 %v5831_v37, %v1521_v39 }
 0x668   : > { %v1520_v43 = vmul.f32 0.35355338, %v1508_v42  ;;  %v1522_v44 = vadd.f32 %v5831_v37, %v1519_v40 }
 0x669   : > { %v1531_v49 = vsel %vm1180_vm3, %v1524_v47, -inf }
 0x66a   : > { %v1525_v45 = vsel %vm1180_vm3, %v1522_v44, -inf  ;;  %v1523_v46 = vadd.f32 %v5831_v37, %v1520_v43 }
 0x66b   : > { %1526 = vmax.xlane.f32.xlu0 %v1525_v45 }
 0x66c   : > { %v1528_v48 = vsel %vm1180_vm3, %v1523_v46, -inf }
 0x66d   : > { %1529 = vmax.xlane.f32.xlu1 %v1528_v48 }
 0x66f   : > { %1532 = vmax.xlane.f32.xlu0 %v1531_v49 }
 0x6f8   : > { %v1527_v50 = vpop.xlane.xlu0 %1526 }
 0x6f9   : > { %v1534_v51 = vsub.f32 %v1522_v44, %v1527_v50 }
 0x6fa   : > { %v1530_v52 = vpop.xlane.xlu1 %1529 }
 0x6fb   : > { %v1537_v53 = vmul.f32 1.442695, %v1534_v51  ;;  %v1535_v54 = vsub.f32 %v1523_v46, %v1530_v52 }
 0x6fc   : > { %v1533_v55 = vpop.xlane.xlu0 %1532 }
 0x6fd   : > { %5378 = vpow2.f32 %v1537_v53  ;;  %v1539_v56 = vmul.f32 1.442695, %v1535_v54  ;;  %v1536_v57 = vsub.f32 %v1524_v47, %v1533_v55 }
 0x6ff   : > { %5380 = vpow2.f32 %v1539_v56  ;;  %v1541_v59 = vmul.f32 1.442695, %v1536_v57 }
 0x701   : > { %5382 = vpow2.f32 %v1541_v59 }
 0x707   : > { %v5379_v60 = vpop.eup %5378 }
 0x708   : > { %v1543_v61 = vsel %vm1180_vm3, %v5379_v60, 0.0 }
 0x709   : > { %v5381_v62 = vpop.eup %5380  ;;  %1544 = vadd.xlane.f32.xlu0 %v1543_v61 }
 0x70a   : > { %v1546_v1 = vsel %vm1180_vm3, %v5381_v62, 0.0 }
 0x70b   : > { %v5383_v63 = vpop.eup %5382 }
 0x70c   : > { %v1549_v0 = vsel %vm1180_vm3, %v5383_v63, 0.0 }
 0x70d   : > { %1550 = vadd.xlane.f32.xlu1 %v1549_v0  ;;  %1547 = vadd.xlane.f32.xlu0 %v1546_v1 }
 0x71e   : > { %1562 = vrot.lane.b32.xlu1 %v5851_v10, %s5514_s3 }
 0x722   : > { %1626 = vrot.lane.b32.xlu1 %v5803_v25, %s5515_s4 }
 0x723   : > { %1560 = vrot.lane.b32.xlu0 %v5844_v58, %s5514_s3 }
 0x726   : > { %1628 = vrot.lane.b32.xlu1 %v5805_v28, %s5515_s4 }
 0x727   : > { %1622 = vrot.lane.b32.xlu0 %v5811_v30, %s5515_s4 }
 0x72a   : > { %1624 = vrot.lane.b32.xlu1 %v5819_v33, %s5515_s4 }
 0x796   : > { %v1545_v2 = vpop.xlane.xlu0 %1544 }
 0x797   : > { %5384 = vrcp.f32 %v1545_v2 }
 0x79a   : > { %v1548_v3 = vpop.xlane.xlu0 %1547  ;;  %v1551_v4 = vpop.xlane.xlu1 %1550 }
 0x79b   : > { %5386 = vrcp.f32 %v1548_v3 }
 0x79c   : > { %5388 = vrcp.f32 %v1551_v4 }
 0x79e   : > { %v1561_v5 = vpop.permute.xlu0 %1560  ;;  %v1563_v25 = vpop.permute.xlu1 %1562 }
 0x79f   : > { %5077 = vmatprep.subr.bf16.mxu0 %v1561_v5  ;;  %v1572_v28 = vsel %vm1222_vm4, %v1563_v25, 0 }
 0x7a0   : > { %5078 = vmatpush3.bf16.msra.mxu0 %v1561_v5 }
 0x7a1   : > { %5117 = vmatprep.subr.msk.bf16.mxu0 %vm1222_vm4, %v1563_v25  ;;  %v5385_v6 = vpop.eup %5384 }
 0x7a2   : > { %v1627_v7 = vpop.permute.xlu1 %1626  ;;  %v1555_v8 = vmul.f32 %v5385_v6, %v5379_v60  ;;  %v1623_v14 = vpop.permute.xlu0 %1622 }
 0x7a3   : > { %v1637_v15 = vsel %vm1113_vm2, %v1627_v7, 0 }
 0x7a4   : > { %5080 = vmatpush3.bf16.msra.mxu0 %v1572_v28  ;;  %v5224_v28 = vld [vmem:[%s5734_s5] sm:$0xff]  }
 0x7a5   : > { %v5387_v30 = vpop.eup %5386  ;;  %5118 = vmatprep.subr.msk.bf16.mxu0 %vm1113_vm2, %v1627_v7  ;;  %v5225_v7 = vld [vmem:[%s5734_s5 + $0x8] sm:$0xff]  }
 0x7a6   : > { %v5389_v33 = vpop.eup %5388  ;;  %v1556_v9 = vmul.f32 %v5387_v30, %v5381_v62  ;;  %v1629_v16 = vpop.permute.xlu1 %1628 }
 0x7a7   : > { %v1557_v11 = vmul.f32 %v5389_v33, %v5383_v63  ;;  %v1640_v17 = vsel %vm1113_vm2, %v1629_v16, 0 }
 0x7a8   : > { %v1558_v12 = vpack.c.bf16 %v1556_v9, %v1555_v8 }
 0x7a9   : > { %v1559_v13 = vpack.c.bf16 %v1557_v11, %v1557_v11 }
 0x7aa   : > { %5081 = vmatprep.mubr.msk.bf16.mxu0 %vm1180_vm3, %v1558_v12  ;;  %v1625_v18 = vpop.permute.xlu1 %1624 }
 0x7ab   : > { %5082 = vmatmul.mubr.msk.bf16.vlgmr.msra.gmra.mrb[16].mxu0 %vm1180_vm3, %v1559_v13 }
 0x7ac   : > { %5089 = vmatprep.mubr.msk.bf16.mxu0 %vm1113_vm2, %v1623_v14 }
 0x7ad   : > { %5086 = vmatpush3.bf16.xpose.msra.mxu0 %v1637_v15 }
 0x7ae   : > { %5119 = vmatprep.subr.msk.bf16.mxu0 %vm1113_vm2, %v1629_v16 }
 0x7b5   : > { %5088 = vmatpush3.bf16.xpose.msra.mxu0 %v1640_v17 }
 0x7bc   : > { %5090 = vmatmul.mubr.msk.bf16.vlgmr.msra.gmra.mrb[20].mxu0 %vm1113_vm2, %v1625_v18 }
 0x87e   : > { %v5083_v19 = vpop.f32.mrb[16].mxu0 }
 0x87f   : > { %v1608_v20 = vpop.f32.mrb[17].mxu0 }
 0x880   : > { %v5084_v21 = vpop.f32.mrb[18].mxu0 }
 0x881   : > { %v1611_v22 = vpop.f32.mrb[19].mxu0 }
 0x882   : > { %v5208_v23 = vpack.i.bf16 %v1611_v22, %v1608_v20 }
 0x88f   : > { %v5091_v27 = vpop.f32.mrb[20].mxu0 }
 0x890   : > { %v1676_v35 = vpop.f32.mrb[21].mxu0  ;;  %v1692_v38 = vmul.f32 0.35355338, %v5091_v27 }
 0x891   : > { %v1690_v39 = vmul.f32 0.35355338, %v1676_v35  ;;  %v5092_v40 = vpop.f32.mrb[22].mxu0 }
 0x892   : > { %v1679_v41 = vpop.f32.mrb[23].mxu0  ;;  %v1695_v46 = vadd.f32 %v5831_v37, %v1692_v38 }
 0x893   : > { %v1691_v42 = vmul.f32 0.35355338, %v1679_v41  ;;  %v1693_v43 = vadd.f32 %v5831_v37, %v1690_v39 }
 0x894   : > { %v1702_v48 = vsel %vm1180_vm3, %v1695_v46, -inf }
 0x895   : > { %v1696_v44 = vsel %vm1180_vm3, %v1693_v43, -inf  ;;  %v1694_v45 = vadd.f32 %v5831_v37, %v1691_v42 }
 0x896   : > { %1697 = vmax.xlane.f32.xlu0 %v1696_v44 }
 0x897   : > { %v1699_v47 = vsel %vm1180_vm3, %v1694_v45, -inf }
 0x898   : > { %1700 = vmax.xlane.f32.xlu1 %v1699_v47 }
 0x89a   : > { %1703 = vmax.xlane.f32.xlu0 %v1702_v48 }
 0x923   : > { %v1698_v49 = vpop.xlane.xlu0 %1697 }
 0x924   : > { %v1705_v50 = vsub.f32 %v1693_v43, %v1698_v49 }
 0x925   : > { %v1701_v51 = vpop.xlane.xlu1 %1700 }
 0x926   : > { %v1708_v52 = vmul.f32 1.442695, %v1705_v50  ;;  %v1706_v53 = vsub.f32 %v1694_v45, %v1701_v51 }
 0x927   : > { %v1704_v54 = vpop.xlane.xlu0 %1703 }
 0x928   : > { %5390 = vpow2.f32 %v1708_v52  ;;  %v1710_v55 = vmul.f32 1.442695, %v1706_v53  ;;  %v1707_v56 = vsub.f32 %v1695_v46, %v1704_v54  ;;  %v5414_v52 = vld [vmem:[%s5777_s24] sm:$0xff] }
 0x92a   : > { %5392 = vpow2.f32 %v1710_v55  ;;  %v1712_v57 = vmul.f32 1.442695, %v1707_v56  ;;  %v5415_v55 = vld [vmem:[%s5777_s24 + $0x8] sm:$0xff] }
 0x92c   : > { %5394 = vpow2.f32 %v1712_v57  ;;  %v5416_v57 = vld [vmem:[%s5777_s24 + $0x10] sm:$0xff] }
 0x932   : > { %v5391_v37 = vpop.eup %5390 }
 0x933   : > { %v1714_v59 = vsel %vm1180_vm3, %v5391_v37, 0.0 }
 0x934   : > { %v5393_v60 = vpop.eup %5392  ;;  %1715 = vadd.xlane.f32.xlu0 %v1714_v59 }
 0x935   : > { %v1717_v63 = vsel %vm1180_vm3, %v5393_v60, 0.0 }
 0x936   : > { %v5395_v61 = vpop.eup %5394 }
 0x937   : > { %v1720_v62 = vsel %vm1180_vm3, %v5395_v61, 0.0 }
 0x938   : > { %1721 = vadd.xlane.f32.xlu1 %v1720_v62  ;;  %1718 = vadd.xlane.f32.xlu0 %v1717_v63 }
 0x949   : > { %1733 = vrot.lane.b32.xlu1 %v5851_v10, %s5515_s4 }
 0x94d   : > { %5204 = vrot.lane.b32.xlu1 %v5203_v31, %s5516_s10 }
 0x94e   : > { %1731 = vrot.lane.b32.xlu0 %v5844_v58, %s5515_s4 }
 0x951   : > { %1800 = vrot.lane.b32.xlu1 %v5910_v24, %s5516_s10 }
 0x952   : > { %5209 = vrot.lane.b32.xlu0 %v5208_v23, %s5517_s11 }
 0x955   : > { %1812 = vrot.lane.b32.xlu1 %v5083_v19, %s5517_s11 }
 0x9c1   : > { %v1716_v0 = vpop.xlane.xlu0 %1715 }
 0x9c2   : > { %5396 = vrcp.f32 %v1716_v0 }
 0x9c5   : > { %v1719_v1 = vpop.xlane.xlu0 %1718  ;;  %v1722_v2 = vpop.xlane.xlu1 %1721 }
 0x9c6   : > { %5398 = vrcp.f32 %v1719_v1 }
 0x9c7   : > { %5400 = vrcp.f32 %v1722_v2 }
 0x9c9   : > { %v1732_v10 = vpop.permute.xlu0 %1731  ;;  %v1734_v26 = vpop.permute.xlu1 %1733 }
 0x9ca   : > { %5093 = vmatprep.subr.bf16.mxu1 %v1732_v10  ;;  %v1743_v24 = vsel %vm1222_vm4, %v1734_v26, 0 }
 0x9cb   : > { %5094 = vmatpush3.bf16.msra.mxu1 %v1732_v10 }
 0x9cc   : > { %5120 = vmatprep.subr.msk.bf16.mxu1 %vm1222_vm4, %v1734_v26  ;;  %v5397_v58 = vpop.eup %5396 }
 0x9cd   : > { %v1726_v3 = vmul.f32 %v5397_v58, %v5391_v37  ;;  %v5205_v12 = vpop.permute.xlu1 %5204  ;;  %v5210_v14 = vpop.permute.xlu0 %5209 }
 0x9ce   : > { %v5207_v15 = vunpack.i.h.bf16 %v5205_v12  ;;  %v5206_v16 = vunpack.i.l.bf16 %v5205_v12  ;;  %v5212_v18 = vunpack.i.h.bf16 %v5210_v14  ;;  %v5211_v19 = vunpack.i.l.bf16 %v5210_v14  ;;  %v2007_v12 = vld [vmem:[%s5752_s2 + $0xc0] sm:$0xff] }
 0x9cf   : > { %5096 = vmatpush3.bf16.msra.mxu1 %v1743_v24 }
 0x9d0   : > { %v5399_v29 = vpop.eup %5398  ;;  %5101 = vmatprep.subr.bf16.mxu1 %v5224_v28  ;;  %v1830_v20 = vsel %vm1113_vm2, %v5877_v36, %v5207_v15  ;;  %v1829_v21 = vsel %vm1113_vm2, %v5875_v34, %v5206_v16  ;;  %v2008_v15 = vld [vmem:[%s5752_s2 + $0xc8] sm:$0xff] }
 0x9d1   : > { %v5401_v31 = vpop.eup %5400  ;;  %v1727_v4 = vmul.f32 %v5399_v29, %v5393_v60  ;;  %v1801_v13 = vpop.permute.xlu1 %1800  ;;  %v1833_v40 = vsel %vm1832_vm5, %v1829_v21, %v5211_v19  ;;  %v1834_v41 = vsel %vm1832_vm5, %v1830_v20, %v5212_v18  ;;  %v5519_v19 = vmov 0   ;;  %v1985_v20 = vld [vmem:[%s5752_s2 + $0x10] sm:$0xff] }
 0x9d2   : > { %v1728_v5 = vmul.f32 %v5401_v31, %v5395_v61  ;;  %v1831_v23 = vsel %vm1113_vm2, %v5873_v32, %v1801_v13  ;;  %v4546_v32 = vld [vmem:[%s6598_s19] ss:$0 sm:$0xff]  ;;  %v2000_v13 = vld [vmem:[%s5752_s2 + $0x88] sm:$0xff]  ;;  %2297 = vmatprep.mubr.bf16.mxu0 %v5519_v19  ;;  %v1993_v21 = vld [vmem:[%s5752_s2 + $0x50] sm:$0xff] }
 0x9d3   : > { %v1729_v25 = vpack.c.bf16 %v1727_v4, %v1726_v3  ;;  %v4572_v18 = vcombine.high %v2000_v13, %v2008_v15 }
 0x9d4   : > { %v1730_v6 = vpack.c.bf16 %v1728_v5, %v1728_v5 }
 0x9d5   : > { %5097 = vmatprep.mubr.msk.bf16.mxu1 %vm1180_vm3, %v1729_v25  ;;  %v1813_v17 = vpop.permute.xlu1 %1812  ;;  %v1983_v25 = vld [vmem:[%s5752_s2] sm:$0xff] }
 0x9d6   : > { %5098 = vmatmul.mubr.msk.bf16.vlgmr.msra.gmra.mrb[16].mxu1 %vm1180_vm3, %v1730_v6  ;;  %v1835_v35 = vsel %vm1832_vm5, %v1831_v23, %v1813_v17  ;;  %v1991_v6 = vld [vmem:[%s5752_s2 + $0x40] sm:$0xff]  ;;  %v4571_v17 = vcombine.low %v2000_v13, %v2008_v15  ;;  %v4558_v23 = vcombine.high %v1985_v20, %v1993_v21  ;;  %v1990_v13 = vld [vmem:[%s5752_s2 + $0x38] sm:$0xff] }
 0x9d7   : > { %5102 = vmatpush3.bf16.msra.mxu1 %v5224_v28  ;;  %v1984_v28 = vld [vmem:[%s5752_s2 + $0x8] sm:$0xff] }
 0x9d8   : > { %5103 = vmatprep.subr.bf16.mxu1 %v5225_v7 }
 0x9db   : > { %5104 = vmatpush3.bf16.msra.mxu1 %v5225_v7  ;;  %v4554_v7 = vcombine.high %v1983_v25, %v1991_v6 }
 0x9dd   : > { %2265 = vmatprep.subr.bf16.mxu0 %v4554_v7  ;;  %v2012_v7 = vld [vmem:[%s5752_s2 + $0xe8] sm:$0xff] }
 0xaa9   : > { %v5099_v30 = vpop.f32.mrb[16].mxu1 }
 0xaaa   : > { %1824 = vrot.lane.b32.xlu1 %v5099_v30, %s5518_s12  ;;  %v1779_v33 = vpop.f32.mrb[17].mxu1  ;;  %v1992_v30 = vld [vmem:[%s5752_s2 + $0x48] sm:$0xff] }
 0xaab   : > { %v5100_v8 = vpop.f32.mrb[18].mxu1 }
 0xaac   : > { %v1782_v9 = vpop.f32.mrb[19].mxu1  ;;  %v4555_v8 = vcombine.low %v1984_v28, %v1992_v30 }
 0xaad   : > { %v5213_v11 = vpack.i.bf16 %v1782_v9, %v1779_v33  ;;  %v4553_v33 = vcombine.low %v1983_v25, %v1991_v6  ;;  %v4556_v9 = vcombine.high %v1984_v28, %v1992_v30  ;;  %v2003_v25 = vld [vmem:[%s5752_s2 + $0xa0] sm:$0xff]  ;;  %v2004_v28 = vld [vmem:[%s5752_s2 + $0xa8] sm:$0xff] }
 0xaae   : > { %v2011_v6 = vld [vmem:[%s5752_s2 + $0xe0] sm:$0xff] }
 0xaaf   : > { %5214 = vrot.lane.b32.xlu0 %v5213_v11, %s5518_s12  ;;  %2266 = vmatpush1.bf16.msra.mxu0 %v4553_v33  ;;  %v1999_v11 = vld [vmem:[%s5752_s2 + $0x80] sm:$0xff]  ;;  %v4577_v15 = vcombine.low %v2003_v25, %v2011_v6  ;;  %s6606_s12 = sld [smem:[#allocation6_spill]] }
 0xab0   : > { %2316 = vmatprep.subr.bf16.mxu1 %v4556_v9  ;;  %v4570_v14 = vcombine.high %v1999_v11, %v2007_v12  ;;  %v4569_v16 = vcombine.low %v1999_v11, %v2007_v12  ;;  %v4580_v9 = vcombine.high %v2004_v28, %v2012_v7  ;;  %v1989_v11 = vld [vmem:[%s5752_s2 + $0x30] sm:$0xff] }
 0xab1   : > { %v1997_v12 = vld [vmem:[%s5752_s2 + $0x70] sm:$0xff] }
 0xab2   : > { %2267 = vmatprep.subr.bf16.mxu0 %v4570_v14  ;;  %v1998_v14 = vld [vmem:[%s5752_s2 + $0x78] sm:$0xff] }
 0xab3   : > { %2268 = vmatpush1.bf16.msra.mxu0 %v4569_v16  ;;  %v4579_v16 = vcombine.low %v2004_v28, %v2012_v7  ;;  %v6157_v7 = vld [vmem:[%s5757_s8] sm:$0xff] }
 0xab4   : > { %2367 = vmatprep.subr.bf16.mxu0 %v4558_v23  ;;  %v2014_v23 = vld [vmem:[%s5752_s2 + $0xf8] sm:$0xff] }
 0xab5   : > { %s6610_s23 = sand.u32 1, %s6606_s12  }
 0xb1c   : > { %v1825_v22 = vpop.permute.xlu1 %1824 }
 0xb1d   : > { %v1838_v42 = vsel %vm1180_vm3, %v1835_v35, %v1825_v22  ;;  %v1986_v22 = vld [vmem:[%s5752_s2 + $0x18] sm:$0xff]  ;;  %v4557_v35 = vcombine.low %v1985_v20, %v1993_v21  ;;  %v2005_v20 = vld [vmem:[%s5752_s2 + $0xb0] sm:$0xff] }
 0xb1e   : > { %v1840_v44 = vpack.c.bf16 %v1838_v42, %v1838_v42  ;;  %v2013_v21 = vld [vmem:[%s5752_s2 + $0xf0] sm:$0xff] }
 0xb21   : > { %v5215_v27 = vpop.permute.xlu0 %5214 }
 0xb22   : > { %v5217_v38 = vunpack.i.h.bf16 %v5215_v27  ;;  %v5216_v39 = vunpack.i.l.bf16 %v5215_v27  ;;  %v1994_v27 = vld [vmem:[%s5752_s2 + $0x58] sm:$0xff] }
 0xb24   : > { %v1836_v36 = vsel %vm1180_vm3, %v1833_v40, %v5216_v39  ;;  %v1837_v43 = vsel %vm1180_vm3, %v1834_v41, %v5217_v38  ;;  %v4559_v38 = vcombine.low %v1986_v22, %v1994_v27  ;;  %v4560_v39 = vcombine.high %v1986_v22, %v1994_v27  ;;  %v2006_v22 = vld [vmem:[%s5752_s2 + $0xb8] sm:$0xff] }
 0xb25   : > { %v1839_v34 = vpack.c.bf16 %v1837_v43, %v1836_v36  ;;  %v4565_v27 = vcombine.low %v1989_v11, %v1997_v12 }
 0xb27   : > { %5105 = vmatprep.mubr.msk.bf16.mxu1 %vm903_vm1, %v1839_v34 }
 0xb28   : > { %5106 = vmatmul.mubr.msk.bf16.vlgmr.msra.gmra.mrb[20].mxu1 %vm903_vm1, %v1840_v44 }
 0xb29   : > { %2317 = vmatpush1.bf16.msra.mxu1 %v4555_v8  ;;  %2348 = vmatprep.mubr.bf16.mxu1 %v5519_v19  ;;  %v4578_v8 = vcombine.high %v2003_v25, %v2011_v6 }
 0xb2a   : > { %2318 = vmatprep.subr.bf16.mxu1 %v4572_v18  ;;  %v4568_v18 = vcombine.high %v1990_v13, %v1998_v14 }
 0xb2d   : > { %2319 = vmatpush1.bf16.msra.mxu1 %v4571_v17  ;;  %v4566_v17 = vcombine.high %v1989_v11, %v1997_v12 }
 0xb2e   : > { %2418 = vmatprep.subr.bf16.mxu1 %v4560_v39  ;;  %v4584_v39 = vcombine.high %v2006_v22, %v2014_v23 }
 0xbfb   : > { %v5107_v45 = vpop.f32.mrb[20].mxu1 }
 0xbfc   : > { %v1904_v46 = vpop.f32.mrb[21].mxu1  ;;  %v1913_v47 = vadd.f32 %v5107_v45, %v4546_v32 }
 0xbfd   : > { %v1905_v48 = vadd.f32 %v4546_v32, %v1904_v46  ;;  %v5108_v49 = vpop.f32.mrb[22].mxu1 }
 0xbfe   : > { %v1907_v50 = vpop.f32.mrb[23].mxu1  ;;  %v1922_v37 = vadd.f32 %v5416_v57, %v1913_v47 }
 0xbff   : > { %v1908_v51 = vadd.f32 %v4546_v32, %v1907_v50  ;;  %v1920_v53 = vadd.f32 %v5414_v52, %v1905_v48  ;;  %v4551_v48 = vld [vmem:[%s6600_s27] ss:$0 sm:$0xff]  ;;  %s6456_s27 = scalar_lea.sflag [#allocation3], %s6610_s23 }
 0xc00   : > { %v1929_v60 = vsel %vm903_vm1, %v1922_v37, 0.0 }
 0xc01   : > { %v1923_v54 = vsel %vm903_vm1, %v1920_v53, 0.0  ;;  %v1921_v56 = vadd.f32 %v5415_v55, %v1908_v51 }
 0xc02   : > { %1924 = vadd.xlane.f32.xlu0 %v1923_v54 }
 0xc03   : > { %v1926_v59 = vsel %vm903_vm1, %v1921_v56, 0.0 }
 0xc04   : > { %1927 = vadd.xlane.f32.xlu1 %v1926_v59  ;;  %v2009_v59 = vld [vmem:[%s5752_s2 + $0xd0] sm:$0xff] }
 0xc06   : > { %1930 = vadd.xlane.f32.xlu0 %v1929_v60  ;;  %v2002_v60 = vld [vmem:[%s5752_s2 + $0x98] sm:$0xff] }
 0xc8f   : > { %v1925_v61 = vpop.xlane.xlu0 %1924 }
 0xc90   : > { %v1933_v62 = vmul.f32 0.03125, %v1925_v61  ;;  %v2010_v61 = vld [vmem:[%s5752_s2 + $0xd8] sm:$0xff] }
 0xc91   : > { %v1928_v63 = vpop.xlane.xlu1 %1927 }
 0xc92   : > { %v5996_v0 = vsub.f32 %v1920_v53, %v1933_v62  ;;  %v1934_v1 = vmul.f32 0.03125, %v1928_v63  ;;  %v4552_v53 = vld [vmem:[%s6602_s1] ss:$0 sm:$0xff]  ;;  %s5423_s1 = scalar_lea.vmem %s5422_s18, 768 }
 0xc93   : > { %v1931_v2 = vpop.xlane.xlu0 %1930 }
 0xc94   : > { %v5998_v10 = vsub.f32 %v1921_v56, %v1934_v1  ;;  %v1935_v26 = vmul.f32 0.03125, %v1931_v2  ;;  %v1939_v58 = vmul.f32 %v5996_v0, %v5996_v0  ;;  %v2001_v56 = vld [vmem:[%s5752_s2 + $0x90] sm:$0xff]  ;;  %v4576_v1 = vcombine.high %v2002_v60, %v2010_v61  ;;  %v1987_v2 = vld [vmem:[%s5752_s2 + $0x20] sm:$0xff] }
 0xc96   : > { %v6002_v24 = vsub.f32 %v1922_v37, %v1935_v26  ;;  %v1942_v29 = vsel %vm903_vm1, %v1939_v58, 0.0  ;;  %v1940_v31 = vmul.f32 %v5998_v10, %v5998_v10  ;;  %v1988_v26 = vld [vmem:[%s5752_s2 + $0x28] sm:$0xff] }
 0xc97   : > { %1943 = vadd.xlane.f32.xlu0 %v1942_v29  ;;  %v1996_v58 = vld [vmem:[%s5752_s2 + $0x68] sm:$0xff]  ;;  %v4573_v29 = vcombine.low %v2001_v56, %v2009_v59 }
 0xc98   : > { %v1941_v3 = vmul.f32 %v6002_v24, %v6002_v24  ;;  %v1945_v4 = vsel %vm903_vm1, %v1940_v31, 0.0  ;;  %v4575_v31 = vcombine.low %v2002_v60, %v2010_v61  ;;  %v4563_v33 = vcombine.low %v1988_v26, %v1996_v58  ;;  %v5246_v60 = vld [vmem:[%s5767_s14 + $0x68] sm:$0xff]  }
 0xc99   : > { %v5247_v61 = vld [vmem:[%s5767_s14 + $0xe8] sm:$0xff]  }
 0xc9a   : > { %v1948_v5 = vsel %vm903_vm1, %v1941_v3, 0.0 }
 0xc9b   : > { %1946 = vadd.xlane.f32.xlu0 %v1945_v4  ;;  %1949 = vadd.xlane.f32.xlu1 %v1948_v5  ;;  %v4564_v4 = vcombine.high %v1988_v26, %v1996_v58  ;;  %v5254_v26 = vld [vmem:[%s5767_s14 + $0x78] sm:$0xff]  }
 0xc9c   : > { %v5255_v58 = vld [vmem:[%s5767_s14 + $0xf8] sm:$0xff]  }
 0xd24   : > { %v1944_v40 = vpop.xlane.xlu0 %1943 }
 0xd25   : > { %v1951_v41 = vmul.f32 0.03125, %v1944_v40  ;;  %v4581_v40 = vcombine.low %v2005_v20, %v2013_v21 }
 0xd27   : > { %v1954_v42 = vadd.f32 1e-05, %v1951_v41  ;;  %v4583_v41 = vcombine.low %v2006_v22, %v2014_v23 }
 0xd28   : > { %v1950_v36 = vpop.xlane.xlu1 %1949  ;;  %v1947_v43 = vpop.xlane.xlu0 %1946 }
 0xd29   : > { %5402 = vrsqrt.f32 %v1954_v42  ;;  %v1953_v34 = vmul.f32 0.03125, %v1950_v36  ;;  %v1952_v44 = vmul.f32 0.03125, %v1947_v43  ;;  %v5226_v42 = vld [vmem:[%s5767_s14 + $0x40] sm:$0xff]  }
 0xd2a   : > { %v5227_v36 = vld [vmem:[%s5767_s14 + $0xc0] sm:$0xff]  }
 0xd2b   : > { %v1956_v32 = vadd.f32 1e-05, %v1953_v34  ;;  %v1955_v45 = vadd.f32 1e-05, %v1952_v44  ;;  %v5228_v43 = vld [vmem:[%s5767_s14] sm:$0xff]   ;;  %v5230_v44 = vld [vmem:[%s5767_s14 + $0x48] sm:$0xff]  }
 0xd2c   : > { %v5229_v34 = vld [vmem:[%s5767_s14 + $0x80] sm:$0xff]  }
 0xd2d   : > { %5404 = vrsqrt.f32 %v1956_v32  ;;  %v5231_v32 = vld [vmem:[%s5767_s14 + $0xc8] sm:$0xff]  }
 0xd2e   : > { %5406 = vrsqrt.f32 %v1955_v45  ;;  %v5232_v45 = vld [vmem:[%s5767_s14 + $0x8] sm:$0xff]  }
 0xd33   : > { %v5403_v46 = vpop.eup %5402 }
 0xd34   : > { %v1960_v47 = vmul.f32 %v5403_v46, %v5996_v0  ;;  %v4574_v0 = vcombine.high %v2001_v56, %v2009_v59  ;;  %v5233_v46 = vld [vmem:[%s5767_s14 + $0x88] sm:$0xff]   ;;  %v5244_v56 = vld [vmem:[%s5767_s14 + $0x20] sm:$0xff]  }
 0xd35   : > { %v5245_v59 = vld [vmem:[%s5767_s14 + $0xa0] sm:$0xff]  }
 0xd36   : > { %v1969_v51 = vmul.f32 %v4551_v48, %v1960_v47  ;;  %v5234_v47 = vld [vmem:[%s5767_s14 + $0x50] sm:$0xff]  }
 0xd37   : > { %v5405_v49 = vpop.eup %5404 }
 0xd38   : > { %v5407_v50 = vpop.eup %5406  ;;  %v1962_v54 = vmul.f32 %v5405_v49, %v6002_v24  ;;  %v6039_v57 = vadd.f32 %v4552_v53, %v1969_v51  ;;  %v5236_v49 = vld [vmem:[%s5767_s14 + $0x10] sm:$0xff]   ;;  %v5239_v51 = vld [vmem:[%s5767_s14 + $0xd8] sm:$0xff]  }
 0xd39   : > { %v1961_v52 = vmul.f32 %v5407_v50, %v5998_v10  ;;  %v1995_v10 = vld [vmem:[%s5752_s2 + $0x60] sm:$0xff]  ;;  %v5237_v50 = vld [vmem:[%s5767_s14 + $0x90] sm:$0xff]  }
 0xd3a   : > { %v1971_v62 = vmul.f32 %v4551_v48, %v1962_v54  ;;  %v4562_v3 = vcombine.high %v1987_v2, %v1995_v10  ;;  %v4561_v30 = vcombine.low %v1987_v2, %v1995_v10  ;;  %v5242_v54 = vld [vmem:[%s5767_s14 + $0x60] sm:$0xff]   ;;  %v5252_v2 = vld [vmem:[%s5767_s14 + $0x30] sm:$0xff]  }
 0xd3b   : > { %v1970_v55 = vmul.f32 %v4551_v48, %v1961_v52  ;;  %v5235_v48 = vld [vmem:[%s5767_s14 + $0xd0] sm:$0xff]   ;;  %v5240_v52 = vld [vmem:[%s5767_s14 + $0x18] sm:$0xff]  }
 0xd3c   : > { %v6060_v24 = vadd.f32 %v4552_v53, %v1971_v62  ;;  %v5248_v62 = vld [vmem:[%s5767_s14 + $0x28] sm:$0xff]   ;;  %v5253_v10 = vld [vmem:[%s5767_s14 + $0xb0] sm:$0xff]  }
 0xd3d   : > { %v6041_v37 = vadd.f32 %v4552_v53, %v1970_v55  ;;  %v5241_v53 = vld [vmem:[%s5767_s14 + $0x98] sm:$0xff]   ;;  %v5243_v55 = vld [vmem:[%s5767_s14 + $0xe0] sm:$0xff]  }
 0xd3e   : > { %v6064_v5 = vpack.c.bf16 %v6060_v24, %v6060_v24 }
 0xd3f   : > { %v6048_v63 = vpack.c.bf16 %v6041_v37, %v6039_v57 }
 0xd41   : > { %4585 = vmatmul.mubr.msk.bf16.vlgmr.msra.gmra.mrb[24].mxu0 %vm903_vm1, %v6048_v63  ;;  %4587 = vmatmul.mubr.msk.bf16.vlgmr.msra.gmra.mrb[24].mxu1 %vm903_vm1, %v6048_v63 }
 0xd42   : > { %2307 = vmatprep.mubr.bf16.mxu0 %v5519_v19  ;;  %2358 = vmatprep.mubr.bf16.mxu1 %v5519_v19 }
 0xd43   : > { %2368 = vmatpush1.bf16.msra.mxu0 %v4557_v35  ;;  %2419 = vmatpush1.bf16.msra.mxu1 %v4559_v38  ;;  %v4567_v35 = vcombine.low %v1990_v13, %v1998_v14  ;;  %v4582_v38 = vcombine.high %v2005_v20, %v2013_v21 }
 0xd44   : > { %2369 = vmatprep.subr.bf16.mxu0 %v4574_v0  ;;  %2420 = vmatprep.subr.bf16.mxu1 %v4576_v1  ;;  %v5250_v0 = vld [vmem:[%s5767_s14 + $0x70] sm:$0xff]  }
 0xd45   : > { %v5251_v1 = vld [vmem:[%s5767_s14 + $0xf0] sm:$0xff]  }
 0xd47   : > { %2370 = vmatpush1.bf16.msra.mxu0 %v4573_v29  ;;  %2421 = vmatpush1.bf16.msra.mxu1 %v4575_v31  ;;  %v5256_v29 = vld [vmem:[%s5767_s14 + $0x38] sm:$0xff]  }
 0xd48   : > { %2469 = vmatprep.subr.bf16.mxu0 %v4562_v3  ;;  %2520 = vmatprep.subr.bf16.mxu1 %v4564_v4  ;;  %v5257_v31 = vld [vmem:[%s5767_s14 + $0xb8] sm:$0xff]   ;;  %v5258_v3 = vld [vmem:[%s5767_s14 + $0x140] sm:$0xff]  }
 0xd49   : > { %4586 = vmatmul.mubr.msk.bf16.gmra.mrb[28].mxu0 %vm903_vm1, %v6064_v5  ;;  %4588 = vmatmul.mubr.msk.bf16.gmra.mrb[28].mxu1 %vm903_vm1, %v6064_v5  ;;  %v5259_v4 = vld [vmem:[%s5767_s14 + $0x1c0] sm:$0xff]  }
 0xd4a   : > { %2399 = vmatprep.mubr.bf16.mxu0 %v5519_v19  ;;  %2450 = vmatprep.mubr.bf16.mxu1 %v5519_v19 }
 0xd51   : > { %4589 = vmatmul.mubr.msk.bf16.vlgmr.msra.gmra.mrb[32].mxu0 %vm903_vm1, %v6048_v63  ;;  %4591 = vmatmul.mubr.msk.bf16.vlgmr.msra.gmra.mrb[32].mxu1 %vm903_vm1, %v6048_v63 }
 0xd52   : > { %2409 = vmatprep.mubr.bf16.mxu0 %v5519_v19  ;;  %2460 = vmatprep.mubr.bf16.mxu1 %v5519_v19 }
 0xd53   : > { %2470 = vmatpush1.bf16.msra.mxu0 %v4561_v30  ;;  %2521 = vmatpush1.bf16.msra.mxu1 %v4563_v33 }
 0xd54   : > { %2471 = vmatprep.subr.bf16.mxu0 %v4578_v8  ;;  %2522 = vmatprep.subr.bf16.mxu1 %v4580_v9 }
 0xd57   : > { %2472 = vmatpush1.bf16.msra.mxu0 %v4577_v15  ;;  %2523 = vmatpush1.bf16.msra.mxu1 %v4579_v16 }
 0xd58   : > { %2571 = vmatprep.subr.bf16.mxu0 %v4566_v17  ;;  %2622 = vmatprep.subr.bf16.mxu1 %v4568_v18 }
 0xd59   : > { %4590 = vmatmul.mubr.msk.bf16.gmra.mrb[36].mxu0 %vm903_vm1, %v6064_v5  ;;  %4592 = vmatmul.mubr.msk.bf16.gmra.mrb[36].mxu1 %vm903_vm1, %v6064_v5 }
 0xd5a   : > { %2501 = vmatprep.mubr.bf16.mxu0 %v5519_v19  ;;  %2552 = vmatprep.mubr.bf16.mxu1 %v5519_v19 }
 0xd61   : > { %4593 = vmatmul.mubr.msk.bf16.vlgmr.msra.gmra.mrb[40].mxu0 %vm903_vm1, %v6048_v63  ;;  %4595 = vmatmul.mubr.msk.bf16.vlgmr.msra.gmra.mrb[40].mxu1 %vm903_vm1, %v6048_v63 }
 0xd62   : > { %2511 = vmatprep.mubr.bf16.mxu0 %v5519_v19  ;;  %2562 = vmatprep.mubr.bf16.mxu1 %v5519_v19 }
 0xd63   : > { %2572 = vmatpush1.bf16.msra.mxu0 %v4565_v27  ;;  %2623 = vmatpush1.bf16.msra.mxu1 %v4567_v35 }
 0xd64   : > { %2573 = vmatprep.subr.bf16.mxu0 %v4582_v38  ;;  %2624 = vmatprep.subr.bf16.mxu1 %v4584_v39 }
 0xd67   : > { %2574 = vmatpush1.bf16.msra.mxu0 %v4581_v40  ;;  %2625 = vmatpush1.bf16.msra.mxu1 %v4583_v41 }
 0xd68   : > { %4789 = vmatprep.subr.bf16.mxu0 %v5226_v42  ;;  %4817 = vmatprep.subr.bf16.mxu1 %v5227_v36 }
 0xd69   : > { %4594 = vmatmul.mubr.msk.bf16.gmra.mrb[44].mxu0 %vm903_vm1, %v6064_v5  ;;  %4596 = vmatmul.mubr.msk.bf16.gmra.mrb[44].mxu1 %vm903_vm1, %v6064_v5 }
 0xd6a   : > { %2603 = vmatprep.mubr.bf16.mxu0 %v5519_v19  ;;  %2654 = vmatprep.mubr.bf16.mxu1 %v5519_v19 }
 0xd71   : > { %4597 = vmatmul.mubr.msk.bf16.vlgmr.msra.gmra.mrb[48].mxu0 %vm903_vm1, %v6048_v63  ;;  %4599 = vmatmul.mubr.msk.bf16.vlgmr.msra.gmra.mrb[48].mxu1 %vm903_vm1, %v6048_v63  ;;  %v5249_v63 = vld [vmem:[%s5767_s14 + $0xa8] sm:$0xff]  }
 0xd72   : > { %2613 = vmatprep.mubr.bf16.mxu0 %v5519_v19  ;;  %2664 = vmatprep.mubr.bf16.mxu1 %v5519_v19  ;;  %v5238_v19 = vld [vmem:[%s5767_s14 + $0x58] sm:$0xff]  }
 0xd73   : > { %4790 = vmatpush3.bf16.msra.mxu0 %v5228_v43  ;;  %4818 = vmatpush3.bf16.msra.mxu1 %v5229_v34 }
 0xd74   : > { %4791 = vmatprep.subr.bf16.mxu0 %v5230_v44  ;;  %4819 = vmatprep.subr.bf16.mxu1 %v5231_v32 }
 0xd77   : > { %4792 = vmatpush3.bf16.msra.mxu0 %v5232_v45  ;;  %4820 = vmatpush3.bf16.msra.mxu1 %v5233_v46 }
 0xd78   : > { %4793 = vmatprep.subr.bf16.mxu0 %v5234_v47  ;;  %4821 = vmatprep.subr.bf16.mxu1 %v5235_v48 }
 0xd79   : > { %4598 = vmatmul.mubr.msk.bf16.gmra.mrb[52].mxu0 %vm903_vm1, %v6064_v5  ;;  %4600 = vmatmul.mubr.msk.bf16.gmra.mrb[52].mxu1 %vm903_vm1, %v6064_v5  ;;  %v2019_v5 = vlaneseq }
 0xd7b   : > { %4794 = vmatpush3.bf16.msra.mxu0 %v5236_v49  ;;  %4822 = vmatpush3.bf16.msra.mxu1 %v5237_v50  ;;  %v6152_v25 = vshrl.u32 %v2019_v5, 7 }
 0xd7c   : > { %4795 = vmatprep.subr.bf16.mxu0 %v5238_v19  ;;  %4823 = vmatprep.subr.bf16.mxu1 %v5239_v51 }
 0xd7d   : > { %v2021_v6 = vsub.s32 0, %v6152_v25  ;;  %v2029_v28 = vsub.s32 2, %v6152_v25  ;;  %v2025_v30 = vsub.s32 1, %v6152_v25  ;;  %v2033_v33 = vsub.s32 3, %v6152_v25 }
 0xd7f   : > { %4796 = vmatpush3.bf16.msra.mxu0 %v5240_v52  ;;  %4824 = vmatpush3.bf16.msra.mxu1 %v5241_v53  ;;  %v2022_v8 = vrot.slane %v6157_v7, %v2021_v6  ;;  %v2030_v9 = vrot.slane %v6157_v7, %v2029_v28  ;;  %v2026_v11 = vrot.slane %v6157_v7, %v2025_v30  ;;  %v5260_v52 = vld [vmem:[%s5767_s14 + $0x100] sm:$0xff]  }
 0xd80   : > { %4797 = vmatprep.subr.bf16.mxu0 %v5242_v54  ;;  %4825 = vmatprep.subr.bf16.mxu1 %v5243_v55  ;;  %v2034_v12 = vrot.slane %v6157_v7, %v2033_v33  ;;  %v5261_v53 = vld [vmem:[%s5767_s14 + $0x180] sm:$0xff]  }
 0xd83   : > { %4798 = vmatpush3.bf16.msra.mxu0 %v5244_v56  ;;  %4826 = vmatpush3.bf16.msra.mxu1 %v5245_v59 }
 0xd84   : > { %4799 = vmatprep.subr.bf16.mxu0 %v5246_v60  ;;  %4827 = vmatprep.subr.bf16.mxu1 %v5247_v61  ;;  %v5262_v60 = vld [vmem:[%s5767_s14 + $0x148] sm:$0xff]  }
 0xd85   : > { %v5263_v61 = vld [vmem:[%s5767_s14 + $0x1c8] sm:$0xff]  }
 0xd87   : > { %4800 = vmatpush3.bf16.msra.mxu0 %v5248_v62  ;;  %4828 = vmatpush3.bf16.msra.mxu1 %v5249_v63  ;;  %v2037_v62 = vsub.s32 4, %v6152_v25  ;;  %v2045_v63 = vsub.s32 6, %v6152_v25 }
 0xd88   : > { %4801 = vmatprep.subr.bf16.mxu0 %v5250_v0  ;;  %4829 = vmatprep.subr.bf16.mxu1 %v5251_v1 }
 0xd8b   : > { %4802 = vmatpush3.bf16.msra.mxu0 %v5252_v2  ;;  %4830 = vmatpush3.bf16.msra.mxu1 %v5253_v10 }
 0xd8c   : > { %4803 = vmatprep.subr.bf16.mxu0 %v5254_v26  ;;  %4831 = vmatprep.subr.bf16.mxu1 %v5255_v58  ;;  %v2041_v26 = vsub.s32 5, %v6152_v25  ;;  %v2049_v58 = vsub.s32 7, %v6152_v25 }
 0xd8f   : > { %4804 = vmatpush3.bf16.msra.mxu0 %v5256_v29  ;;  %4832 = vmatpush3.bf16.msra.mxu1 %v5257_v31 }
 0xd90   : > { %4845 = vmatprep.subr.bf16.mxu0 %v5258_v3  ;;  %4873 = vmatprep.subr.bf16.mxu1 %v5259_v4 }
 0xe14   : > { %v2299_v13 = vpop.f32.mrb[24].mxu0  ;;  %v2350_v14 = vpop.f32.mrb[24].mxu1 }
 0xe15   : > { %v2300_v15 = vadd.f32 %v2299_v13, %v2022_v8  ;;  %v2351_v16 = vadd.f32 %v2350_v14, %v2030_v9  ;;  %v2301_v17 = vpop.f32.mrb[25].mxu0  ;;  %v2352_v18 = vpop.f32.mrb[25].mxu1  ;;  %v6191_v13 = vrot.slane %v6157_v7, %v2045_v63 }
 0xe16   : > { %v2302_v20 = vadd.f32 %v2301_v17, %v2026_v11  ;;  %v2353_v21 = vadd.f32 %v2352_v18, %v2034_v12  ;;  %v2303_v22 = vpop.f32.mrb[26].mxu0  ;;  %v2354_v23 = vpop.f32.mrb[26].mxu1  ;;  %v6201_v17 = vrot.slane %v6157_v7, %v2049_v58  ;;  %v5266_v18 = vld [vmem:[%s5767_s14 + $0x150] sm:$0xff]  }
 0xe17   : > { %v2304_v27 = vadd.f32 %v2303_v22, %v2022_v8  ;;  %v2355_v35 = vadd.f32 %v2354_v23, %v2030_v9  ;;  %v2305_v38 = vpop.f32.mrb[27].mxu0  ;;  %v2356_v39 = vpop.f32.mrb[27].mxu1  ;;  %v2673_v42 = vmax.f32 %v2300_v15, 0.0  ;;  %v2675_v36 = vmax.f32 %v2351_v16, 0.0 }
 0xe18   : > { %v2306_v40 = vadd.f32 %v2305_v38, %v2026_v11  ;;  %v2357_v41 = vadd.f32 %v2356_v39, %v2034_v12  ;;  %v2674_v44 = vmax.f32 %v2302_v20, 0.0  ;;  %v2676_v32 = vmax.f32 %v2353_v21, 0.0  ;;  %v5267_v20 = vld [vmem:[%s5767_s14 + $0x1d0] sm:$0xff]  }
 0xe19   : > { %v2689_v43 = vmax.f32 %v2304_v27, 0.0  ;;  %v2691_v34 = vmax.f32 %v2355_v35, 0.0  ;;  %v6196_v16 = vrot.slane %v6157_v7, %v2041_v26  ;;  %v5268_v27 = vld [vmem:[%s5767_s14 + $0x110] sm:$0xff]  }
 0xe1a   : > { %v2690_v45 = vmax.f32 %v2306_v40, 0.0  ;;  %v2692_v46 = vmax.f32 %v2357_v41, 0.0  ;;  %v5269_v35 = vld [vmem:[%s5767_s14 + $0x190] sm:$0xff]  }
 0xe1b   : > { %v2721_v47 = vpack.c.bf16 %v2689_v43, %v2673_v42  ;;  %v2723_v48 = vpack.c.bf16 %v2691_v34, %v2675_v36  ;;  %v5270_v42 = vld [vmem:[%s5767_s14 + $0x158] sm:$0xff]  }
 0xe1c   : > { %v2722_v49 = vpack.c.bf16 %v2690_v45, %v2674_v44  ;;  %v2724_v50 = vpack.c.bf16 %v2692_v46, %v2676_v32  ;;  %v2309_v19 = vpop.f32.mrb[28].mxu0  ;;  %v2360_v51 = vpop.f32.mrb[28].mxu1  ;;  %v5271_v36 = vld [vmem:[%s5767_s14 + $0x1d8] sm:$0xff]  }
 0xe1d   : > { %v2310_v54 = vadd.f32 %v2309_v19, %v2022_v8  ;;  %v2361_v55 = vadd.f32 %v2360_v51, %v2030_v9  ;;  %v2311_v56 = vpop.f32.mrb[29].mxu0  ;;  %v2362_v59 = vpop.f32.mrb[29].mxu1  ;;  %v5264_v8 = vld [vmem:[%s5767_s14 + $0x108] sm:$0xff]   ;;  %v5272_v19 = vld [vmem:[%s5767_s14 + $0x118] sm:$0xff]  }
 0xe1e   : > { %v2312_v0 = vadd.f32 %v2311_v56, %v2026_v11  ;;  %v2363_v1 = vadd.f32 %v2362_v59, %v2034_v12  ;;  %v2313_v2 = vpop.f32.mrb[30].mxu0  ;;  %v2364_v10 = vpop.f32.mrb[30].mxu1  ;;  %3816 = vmatprep.mubr.bf16.mxu0 %v2722_v49  ;;  %3864 = vmatprep.mubr.bf16.mxu1 %v2724_v50  ;;  %v5265_v9 = vld [vmem:[%s5767_s14 + $0x188] sm:$0xff]   ;;  %v6186_v12 = vrot.slane %v6157_v7, %v2037_v62  ;;  %v5273_v51 = vld [vmem:[%s5767_s14 + $0x198] sm:$0xff]   ;;  %v5274_v56 = vld [vmem:[%s5767_s14 + $0x160] sm:$0xff]  }
 0xe1f   : > { %v2314_v29 = vpop.f32.mrb[31].mxu0  ;;  %v2365_v31 = vpop.f32.mrb[31].mxu1  ;;  %3817 = vmatmul.mubr.bf16.vlgmr.msra.gmra.mrb[56].mxu0 %v2721_v47  ;;  %3865 = vmatmul.mubr.bf16.vlgmr.msra.gmra.mrb[56].mxu1 %v2723_v48  ;;  %v2705_v3 = vmax.f32 %v2310_v54, 0.0  ;;  %v2707_v11 = vmax.f32 %v2361_v55, 0.0  ;;  %v5275_v59 = vld [vmem:[%s5767_s14 + $0x1e0] sm:$0xff]  }
 0xe20   : > { %v2706_v4 = vmax.f32 %v2312_v0, 0.0  ;;  %v2708_v5 = vmax.f32 %v2363_v1, 0.0  ;;  %4846 = vmatpush3.bf16.msra.mxu0 %v5260_v52  ;;  %4874 = vmatpush3.bf16.msra.mxu1 %v5261_v53 }
 0xe21   : > { %4847 = vmatprep.subr.bf16.mxu0 %v5262_v60  ;;  %4875 = vmatprep.subr.bf16.mxu1 %v5263_v61  ;;  %v2737_v21 = vpack.c.bf16 %v2705_v3, %v2705_v3  ;;  %v2739_v38 = vpack.c.bf16 %v2707_v11, %v2707_v11 }
 0xe22   : > { %v2738_v14 = vpack.c.bf16 %v2706_v4, %v2706_v4  ;;  %v2740_v15 = vpack.c.bf16 %v2708_v5, %v2708_v5  ;;  %v5276_v5 = vld [vmem:[%s5767_s14 + $0x120] sm:$0xff]  }
 0xe24   : > { %4848 = vmatpush3.bf16.msra.mxu0 %v5264_v8  ;;  %4876 = vmatpush3.bf16.msra.mxu1 %v5265_v9  ;;  %v2401_v22 = vpop.f32.mrb[32].mxu0  ;;  %v2452_v23 = vpop.f32.mrb[32].mxu1  ;;  %v5277_v8 = vld [vmem:[%s5767_s14 + $0x1a0] sm:$0xff]  }
 0xe25   : > { %v2402_v39 = vadd.f32 %v2401_v22, %v6186_v12  ;;  %v2453_v40 = vadd.f32 %v2452_v23, %v6191_v13  ;;  %3824 = vmatprep.mubr.bf16.mxu0 %v2738_v14  ;;  %3872 = vmatprep.mubr.bf16.mxu1 %v2740_v15  ;;  %v2403_v7 = vpop.f32.mrb[33].mxu0  ;;  %v2454_v41 = vpop.f32.mrb[33].mxu1  ;;  %v5278_v14 = vld [vmem:[%s5767_s14 + $0x168] sm:$0xff]  }
 0xe26   : > { %v2404_v43 = vadd.f32 %v2403_v7, %v6196_v16  ;;  %v2455_v34 = vadd.f32 %v2454_v41, %v6201_v17  ;;  %v2405_v44 = vpop.f32.mrb[34].mxu0  ;;  %v2456_v32 = vpop.f32.mrb[34].mxu1  ;;  %4849 = vmatprep.subr.bf16.mxu0 %v5266_v18  ;;  %4877 = vmatprep.subr.bf16.mxu1 %v5267_v20  ;;  %v5279_v15 = vld [vmem:[%s5767_s14 + $0x1e8] sm:$0xff]   ;;  %v5283_v7 = vld [vmem:[%s5767_s14 + $0x1f0] sm:$0xff]  }
 0xe27   : > { %v2406_v45 = vadd.f32 %v2405_v44, %v6186_v12  ;;  %v2457_v46 = vadd.f32 %v2456_v32, %v6191_v13  ;;  %v2407_v47 = vpop.f32.mrb[35].mxu0  ;;  %v2458_v48 = vpop.f32.mrb[35].mxu1  ;;  %3825 = vmatmul.mubr.bf16.gmra.mrb[60].mxu0 %v2737_v21  ;;  %3873 = vmatmul.mubr.bf16.gmra.mrb[60].mxu1 %v2739_v38  ;;  %v2677_v52 = vmax.f32 %v2402_v39, 0.0  ;;  %v2679_v53 = vmax.f32 %v2453_v40, 0.0  ;;  %v6234_v21 = vld [vmem:[%s5757_s8 + $0x8] sm:$0xff]  ;;  %v5282_v40 = vld [vmem:[%s5767_s14 + $0x170] sm:$0xff]  }
 0xe28   : > { %v2408_v49 = vadd.f32 %v2407_v47, %v6196_v16  ;;  %v2459_v50 = vadd.f32 %v2458_v48, %v6201_v17  ;;  %4850 = vmatpush3.bf16.msra.mxu0 %v5268_v27  ;;  %4878 = vmatpush3.bf16.msra.mxu1 %v5269_v35  ;;  %v2678_v60 = vmax.f32 %v2404_v43, 0.0  ;;  %v2680_v61 = vmax.f32 %v2455_v34, 0.0  ;;  %v5280_v27 = vld [vmem:[%s5767_s14 + $0x128] sm:$0xff]   ;;  %v5284_v34 = vld [vmem:[%s5767_s14 + $0x130] sm:$0xff]   ;;  %v5287_v47 = vld [vmem:[%s5767_s14 + $0x1f8] sm:$0xff]  }
 0xe29   : > { %v2693_v54 = vmax.f32 %v2406_v45, 0.0  ;;  %v2695_v55 = vmax.f32 %v2457_v46, 0.0  ;;  %4851 = vmatprep.subr.bf16.mxu0 %v5270_v42  ;;  %4879 = vmatprep.subr.bf16.mxu1 %v5271_v36  ;;  %v5281_v35 = vld [vmem:[%s5767_s14 + $0x1a8] sm:$0xff]   ;;  %v6241_v38 = vrot.slane %v6234_v21, %v2021_v6  ;;  %v2062_v39 = vrot.slane %v6234_v21, %v2029_v28  ;;  %v5285_v44 = vld [vmem:[%s5767_s14 + $0x1b0] sm:$0xff]  }
 0xe2a   : > { %v2694_v0 = vmax.f32 %v2408_v49, 0.0  ;;  %v2696_v1 = vmax.f32 %v2459_v50, 0.0  ;;  %v6251_v41 = vrot.slane %v6234_v21, %v2025_v30  ;;  %v6256_v42 = vrot.slane %v6234_v21, %v2033_v33  ;;  %v5286_v33 = vld [vmem:[%s5767_s14 + $0x178] sm:$0xff]  }
 0xe2b   : > { %v6221_v2 = vpack.c.bf16 %v2693_v54, %v2677_v52  ;;  %v6223_v10 = vpack.c.bf16 %v2695_v55, %v2679_v53 }
 0xe2c   : > { %v2726_v29 = vpack.c.bf16 %v2694_v0, %v2678_v60  ;;  %v2728_v31 = vpack.c.bf16 %v2696_v1, %v2680_v61  ;;  %4852 = vmatpush3.bf16.msra.mxu0 %v5272_v19  ;;  %4880 = vmatpush3.bf16.msra.mxu1 %v5273_v51  ;;  %v6225_v3 = vpop.f32.mrb[36].mxu0  ;;  %v6227_v4 = vpop.f32.mrb[36].mxu1  ;;  %v5289_v60 = vld [vmem:[%s5767_s14 + $0x1b8] sm:$0xff]  }
 0xe2d   : > { %v2413_v9 = vpop.f32.mrb[37].mxu0  ;;  %v2464_v11 = vpop.f32.mrb[37].mxu1  ;;  %4853 = vmatprep.subr.bf16.mxu0 %v5274_v56  ;;  %4881 = vmatprep.subr.bf16.mxu1 %v5275_v59  ;;  %v5288_v59 = vld [vmem:[%s5767_s14 + $0x138] sm:$0xff]  }
 0xe2e   : > { %v2415_v18 = vpop.f32.mrb[38].mxu0  ;;  %v2466_v20 = vpop.f32.mrb[38].mxu1  ;;  %3912 = vmatprep.mubr.bf16.mxu0 %v2726_v29  ;;  %3960 = vmatprep.mubr.bf16.mxu1 %v2728_v31  ;;  %v2414_v6 = vadd.f32 %v2413_v9, %v6196_v16  ;;  %v2465_v36 = vadd.f32 %v2464_v11, %v6201_v17  ;;  %v5290_v31 = vld [vmem:[%s5767_s14 + $0x240] sm:$0xff]  }
 0xe2f   : > { %v2416_v22 = vpop.f32.mrb[39].mxu0  ;;  %v2467_v23 = vpop.f32.mrb[39].mxu1  ;;  %v2412_v20 = vadd.f32 %v6225_v3, %v6186_v12  ;;  %v5292_v12 = vld [vmem:[%s5767_s14 + $0x200] sm:$0xff]  }
 0xe30   : > { %4854 = vmatpush3.bf16.msra.mxu0 %v5276_v5  ;;  %4882 = vmatpush3.bf16.msra.mxu1 %v5277_v8  ;;  %v2710_v53 = vmax.f32 %v2414_v6, 0.0  ;;  %v2712_v54 = vmax.f32 %v2465_v36, 0.0  ;;  %v5291_v5 = vld [vmem:[%s5767_s14 + $0x2c0] sm:$0xff]  }
 0xe31   : > { %4855 = vmatprep.subr.bf16.mxu0 %v5278_v14  ;;  %4883 = vmatprep.subr.bf16.mxu1 %v5279_v15  ;;  %v5293_v3 = vld [vmem:[%s5767_s14 + $0x280] sm:$0xff]  }
 0xe34   : > { %4856 = vmatpush3.bf16.msra.mxu0 %v5280_v27  ;;  %4884 = vmatpush3.bf16.msra.mxu1 %v5281_v35  ;;  %v2503_v28 = vpop.f32.mrb[40].mxu0  ;;  %v2554_v43 = vpop.f32.mrb[40].mxu1 }
 0xe35   : > { %v2504_v30 = vadd.f32 %v2503_v28, %v6241_v38  ;;  %v2555_v32 = vadd.f32 %v2554_v43, %v2062_v39  ;;  %v2505_v45 = vpop.f32.mrb[41].mxu0  ;;  %v2556_v46 = vpop.f32.mrb[41].mxu1  ;;  %4857 = vmatprep.subr.bf16.mxu0 %v5282_v40  ;;  %4885 = vmatprep.subr.bf16.mxu1 %v5283_v7  ;;  %v2463_v40 = vadd.f32 %v6227_v4, %v6191_v13 }
 0xe36   : > { %v2506_v16 = vadd.f32 %v2505_v45, %v6251_v41  ;;  %v2557_v17 = vadd.f32 %v2556_v46, %v6256_v42  ;;  %v2507_v48 = vpop.f32.mrb[42].mxu0  ;;  %v2558_v49 = vpop.f32.mrb[42].mxu1  ;;  %v2742_v28 = vpack.c.bf16 %v2710_v53, %v2710_v53  ;;  %v2744_v43 = vpack.c.bf16 %v2712_v54, %v2712_v54  ;;  %v5296_v46 = vld [vmem:[%s5767_s14 + $0x208] sm:$0xff]   ;;  %v5300_v53 = vld [vmem:[%s5767_s14 + $0x210] sm:$0xff]  }
 0xe37   : > { %v2508_v50 = vadd.f32 %v2507_v48, %v6241_v38  ;;  %v2559_v19 = vadd.f32 %v2558_v49, %v2062_v39  ;;  %v2509_v51 = vpop.f32.mrb[43].mxu0  ;;  %v2560_v52 = vpop.f32.mrb[43].mxu1  ;;  %v2681_v61 = vmax.f32 %v2504_v30, 0.0  ;;  %v2683_v0 = vmax.f32 %v2555_v32, 0.0  ;;  %v5294_v30 = vld [vmem:[%s5767_s14 + $0x248] sm:$0xff]   ;;  %v5301_v54 = vld [vmem:[%s5767_s14 + $0x290] sm:$0xff]  }
 0xe38   : > { %v2510_v55 = vadd.f32 %v2509_v51, %v6251_v41  ;;  %v2561_v56 = vadd.f32 %v2560_v52, %v6256_v42  ;;  %4858 = vmatpush3.bf16.msra.mxu0 %v5284_v34  ;;  %4886 = vmatpush3.bf16.msra.mxu1 %v5285_v44  ;;  %v2682_v8 = vmax.f32 %v2506_v16, 0.0  ;;  %v2684_v9 = vmax.f32 %v2557_v17, 0.0  ;;  %v5295_v32 = vld [vmem:[%s5767_s14 + $0x2c8] sm:$0xff]   ;;  %v5298_v17 = vld [vmem:[%s5767_s14 + $0x250] sm:$0xff]  }
 0xe39   : > { %v2697_v1 = vmax.f32 %v2508_v50, 0.0  ;;  %v2699_v29 = vmax.f32 %v2559_v19, 0.0  ;;  %4859 = vmatprep.subr.bf16.mxu0 %v5286_v33  ;;  %4887 = vmatprep.subr.bf16.mxu1 %v5287_v47  ;;  %v2711_v45 = vmax.f32 %v2463_v40, 0.0  ;;  %v5297_v33 = vld [vmem:[%s5767_s14 + $0x288] sm:$0xff]   ;;  %v2070_v47 = vrot.slane %v6234_v21, %v2037_v62  ;;  %v5299_v62 = vld [vmem:[%s5767_s14 + $0x2d0] sm:$0xff]  }
 0xe3a   : > { %v2698_v11 = vmax.f32 %v2510_v55, 0.0  ;;  %v2700_v14 = vmax.f32 %v2561_v56, 0.0  ;;  %v6316_v16 = vrot.slane %v6234_v21, %v2049_v58  ;;  %v5302_v56 = vld [vmem:[%s5767_s14 + $0x258] sm:$0xff]  }
 0xe3b   : > { %v6274_v15 = vpack.c.bf16 %v2697_v1, %v2681_v61  ;;  %v6276_v18 = vpack.c.bf16 %v2699_v29, %v2683_v0 }
 0xe3c   : > { %v6280_v22 = vpack.c.bf16 %v2698_v11, %v2682_v8  ;;  %v6282_v23 = vpack.c.bf16 %v2700_v14, %v2684_v9  ;;  %4860 = vmatpush3.bf16.msra.mxu0 %v5288_v59  ;;  %4888 = vmatpush3.bf16.msra.mxu1 %v5289_v60  ;;  %v6284_v27 = vpop.f32.mrb[44].mxu0  ;;  %v2564_v35 = vpop.f32.mrb[44].mxu1  ;;  %v5303_v59 = vld [vmem:[%s5767_s14 + $0x2d8] sm:$0xff]  }
 0xe3d   : > { %v6288_v7 = vadd.f32 %v2564_v35, %v2062_v39  ;;  %v6290_v6 = vpop.f32.mrb[45].mxu0  ;;  %v6292_v36 = vpop.f32.mrb[45].mxu1  ;;  %4901 = vmatprep.subr.bf16.mxu0 %v5290_v31  ;;  %4929 = vmatprep.subr.bf16.mxu1 %v5291_v5  ;;  %v2709_v39 = vmax.f32 %v2412_v20, 0.0  ;;  %v5304_v14 = vld [vmem:[%s5767_s14 + $0x218] sm:$0xff]  }
 0xe3e   : > { %v2517_v34 = vpop.f32.mrb[46].mxu0  ;;  %v2568_v44 = vpop.f32.mrb[46].mxu1  ;;  %v5305_v20 = vld [vmem:[%s5767_s14 + $0x298] sm:$0xff]  }
 0xe3f   : > { %3913 = vmatmul.mubr.bf16.vlgmr.msra.gmra.mrb[64].mxu0 %v6221_v2  ;;  %3961 = vmatmul.mubr.bf16.vlgmr.msra.gmra.mrb[64].mxu1 %v6223_v10  ;;  %v2518_v13 = vpop.f32.mrb[47].mxu0  ;;  %v2569_v4 = vpop.f32.mrb[47].mxu1  ;;  %v2078_v2 = vrot.slane %v6234_v21, %v2045_v63  ;;  %v6311_v10 = vrot.slane %v6234_v21, %v2041_v26  ;;  %v2741_v48 = vpack.c.bf16 %v2709_v39, %v2709_v39 }
 0xe40   : > { %3920 = vmatprep.mubr.bf16.mxu0 %v2742_v28  ;;  %3968 = vmatprep.mubr.bf16.mxu1 %v2744_v43  ;;  %v2743_v63 = vpack.c.bf16 %v2711_v45, %v2711_v45  ;;  %v5307_v28 = vld [vmem:[%s5767_s14 + $0x2e0] sm:$0xff]  }
 0xe41   : > { %4902 = vmatpush3.bf16.msra.mxu0 %v5292_v12  ;;  %4930 = vmatpush3.bf16.msra.mxu1 %v5293_v3 }
 0xe42   : > { %4903 = vmatprep.subr.bf16.mxu0 %v5294_v30  ;;  %4931 = vmatprep.subr.bf16.mxu1 %v5295_v32 }
 0xe44   : > { %v2605_v49 = vpop.f32.mrb[48].mxu0  ;;  %v2656_v50 = vpop.f32.mrb[48].mxu1 }
 0xe45   : > { %4904 = vmatpush3.bf16.msra.mxu0 %v5296_v46  ;;  %4932 = vmatpush3.bf16.msra.mxu1 %v5297_v33  ;;  %v2606_v19 = vadd.f32 %v2605_v49, %v2070_v47  ;;  %v2657_v51 = vadd.f32 %v2656_v50, %v2078_v2  ;;  %v2607_v52 = vpop.f32.mrb[49].mxu0  ;;  %v2658_v26 = vpop.f32.mrb[49].mxu1  ;;  %v5308_v46 = vld [vmem:[%s5767_s14 + $0x220] sm:$0xff]   ;;  %v5312_v50 = vld [vmem:[%s5767_s14 + $0x228] sm:$0xff]  }
 0xe46   : > { %v2608_v25 = vadd.f32 %v2607_v52, %v6311_v10  ;;  %v2659_v58 = vadd.f32 %v2658_v26, %v6316_v16  ;;  %v2609_v21 = vpop.f32.mrb[50].mxu0  ;;  %v2660_v55 = vpop.f32.mrb[50].mxu1  ;;  %4905 = vmatprep.subr.bf16.mxu0 %v5298_v17  ;;  %4933 = vmatprep.subr.bf16.mxu1 %v5299_v62  ;;  %v5309_v33 = vld [vmem:[%s5767_s14 + $0x2a0] sm:$0xff]   ;;  %v5316_v52 = vld [vmem:[%s5767_s14 + $0x230] sm:$0xff]  }
 0xe47   : > { %v2610_v60 = vadd.f32 %v2609_v21, %v2070_v47  ;;  %v2661_v61 = vadd.f32 %v2660_v55, %v2078_v2  ;;  %3921 = vmatmul.mubr.bf16.gmra.mrb[68].mxu0 %v2741_v48  ;;  %3969 = vmatmul.mubr.bf16.gmra.mrb[68].mxu1 %v2743_v63  ;;  %v2611_v0 = vpop.f32.mrb[51].mxu0  ;;  %v2662_v1 = vpop.f32.mrb[51].mxu1  ;;  %v2685_v5 = vmax.f32 %v2606_v19, 0.0  ;;  %v2687_v8 = vmax.f32 %v2657_v51, 0.0  ;;  %v5311_v48 = vld [vmem:[%s5767_s14 + $0x2e8] sm:$0xff]   ;;  %v5314_v19 = vld [vmem:[%s5767_s14 + $0x270] sm:$0xff]  }
 0xe48   : > { %v2612_v29 = vadd.f32 %v2611_v0, %v6311_v10  ;;  %v2663_v31 = vadd.f32 %v2662_v1, %v6316_v16  ;;  %4008 = vmatprep.mubr.bf16.mxu0 %v6280_v22  ;;  %4056 = vmatprep.mubr.bf16.mxu1 %v6282_v23  ;;  %v2686_v35 = vmax.f32 %v2608_v25, 0.0  ;;  %v2688_v40 = vmax.f32 %v2659_v58, 0.0  ;;  %v5306_v22 = vld [vmem:[%s5767_s14 + $0x260] sm:$0xff]   ;;  %v5313_v63 = vld [vmem:[%s5767_s14 + $0x2a8] sm:$0xff]   ;;  %v5315_v51 = vld [vmem:[%s5767_s14 + $0x2f0] sm:$0xff]  }
 0xe49   : > { %v2701_v9 = vmax.f32 %v2610_v60, 0.0  ;;  %v2703_v11 = vmax.f32 %v2661_v61, 0.0  ;;  %4906 = vmatpush3.bf16.msra.mxu0 %v5300_v53  ;;  %4934 = vmatpush3.bf16.msra.mxu1 %v5301_v54  ;;  %v5317_v26 = vld [vmem:[%s5767_s14 + $0x2b0] sm:$0xff]   ;;  %v5318_v53 = vld [vmem:[%s5767_s14 + $0x278] sm:$0xff]   ;;  %v2516_v25 = vadd.f32 %v6290_v6, %v6251_v41  ;;  %v2567_v58 = vadd.f32 %v6292_v36, %v6256_v42  ;;  %v5324_v42 = vld [vmem:[%s5767_s14 + $0x300] sm:$0xff]  }
 0xe4a   : > { %v2702_v12 = vmax.f32 %v2612_v29, 0.0  ;;  %v2704_v3 = vmax.f32 %v2663_v31, 0.0  ;;  %4907 = vmatprep.subr.bf16.mxu0 %v5302_v56  ;;  %4935 = vmatprep.subr.bf16.mxu1 %v5303_v59  ;;  %v5319_v54 = vld [vmem:[%s5767_s14 + $0x2f8] sm:$0xff]   ;;  %v5322_v56 = vld [vmem:[%s5767_s14 + $0x340] sm:$0xff]   ;;  %v2514_v41 = vadd.f32 %v6284_v27, %v6241_v38  ;;  %v5326_v1 = vld [vmem:[%s5767_s14 + $0x348] sm:$0xff]   ;;  %v2715_v27 = vmax.f32 %v6288_v7, 0.0 }
 0xe4b   : > { %v6334_v23 = vpack.c.bf16 %v2701_v9, %v2685_v5  ;;  %v6336_v43 = vpack.c.bf16 %v2703_v11, %v2687_v8  ;;  %v5320_v21 = vld [vmem:[%s5767_s14 + $0x238] sm:$0xff]   ;;  %v5323_v59 = vld [vmem:[%s5767_s14 + $0x3c0] sm:$0xff]   ;;  %v2714_v60 = vmax.f32 %v2516_v25, 0.0  ;;  %v2716_v61 = vmax.f32 %v2567_v58, 0.0  ;;  %v5327_v29 = vld [vmem:[%s5767_s14 + $0x3c8] sm:$0xff]  }
 0xe4c   : > { %v6338_v34 = vpack.c.bf16 %v2702_v12, %v2686_v35  ;;  %v6340_v44 = vpack.c.bf16 %v2704_v3, %v2688_v40  ;;  %v2615_v30 = vpop.f32.mrb[52].mxu0  ;;  %v2666_v32 = vpop.f32.mrb[52].mxu1  ;;  %v5321_v55 = vld [vmem:[%s5767_s14 + $0x2b8] sm:$0xff]   ;;  %v5325_v6 = vld [vmem:[%s5767_s14 + $0x380] sm:$0xff]   ;;  %v2713_v38 = vmax.f32 %v2514_v41, 0.0  ;;  %v5328_v31 = vld [vmem:[%s5767_s14 + $0x308] sm:$0xff]  }
 0xe4d   : > { %4908 = vmatpush3.bf16.msra.mxu0 %v5304_v14  ;;  %4936 = vmatpush3.bf16.msra.mxu1 %v5305_v20  ;;  %v6342_v13 = vadd.f32 %v2615_v30, %v2070_v47  ;;  %v6344_v4 = vadd.f32 %v2666_v32, %v2078_v2  ;;  %v6346_v39 = vpop.f32.mrb[53].mxu0  ;;  %v6348_v45 = vpop.f32.mrb[53].mxu1  ;;  %v5310_v47 = vld [vmem:[%s5767_s14 + $0x268] sm:$0xff]   ;;  %v2746_v36 = vpack.c.bf16 %v2714_v60, %v2714_v60  ;;  %v5330_v8 = vld [vmem:[%s5767_s14 + $0x350] sm:$0xff]   ;;  %v5334_v7 = vld [vmem:[%s5767_s14 + $0x358] sm:$0xff]  }
 0xe4e   : > { %v2619_v17 = vpop.f32.mrb[54].mxu0  ;;  %v2670_v62 = vpop.f32.mrb[54].mxu1  ;;  %4909 = vmatprep.subr.bf16.mxu0 %v5306_v22  ;;  %4937 = vmatprep.subr.bf16.mxu1 %v5307_v28  ;;  %v2748_v0 = vpack.c.bf16 %v2716_v61, %v2716_v61  ;;  %v5329_v5 = vld [vmem:[%s5767_s14 + $0x388] sm:$0xff]   ;;  %v5331_v9 = vld [vmem:[%s5767_s14 + $0x3d0] sm:$0xff]   ;;  %v5335_v20 = vld [vmem:[%s5767_s14 + $0x3d8] sm:$0xff]  }
 0xe4f   : > { %v2620_v49 = vpop.f32.mrb[55].mxu0  ;;  %v2671_v2 = vpop.f32.mrb[55].mxu1  ;;  %v5332_v11 = vld [vmem:[%s5767_s14 + $0x310] sm:$0xff]   ;;  %v5336_v35 = vld [vmem:[%s5767_s14 + $0x318] sm:$0xff]   ;;  %v5338_v12 = vld [vmem:[%s5767_s14 + $0x360] sm:$0xff]  }
 0xe50   : > { %v5333_v14 = vld [vmem:[%s5767_s14 + $0x390] sm:$0xff]   ;;  %v5337_v40 = vld [vmem:[%s5767_s14 + $0x398] sm:$0xff]   ;;  %v5339_v3 = vld [vmem:[%s5767_s14 + $0x3e0] sm:$0xff]   ;;  %v2618_v49 = vadd.f32 %v6346_v39, %v6311_v10  ;;  %v2669_v2 = vadd.f32 %v6348_v45, %v6316_v16  ;;  %v2717_v10 = vmax.f32 %v6342_v13, 0.0  ;;  %v2719_v16 = vmax.f32 %v6344_v4, 0.0 }
 0xe51   : > { %4910 = vmatpush3.bf16.msra.mxu0 %v5308_v46  ;;  %4938 = vmatpush3.bf16.msra.mxu1 %v5309_v33  ;;  %v5340_v22 = vld [vmem:[%s5767_s14 + $0x320] sm:$0xff]   ;;  %v5344_v30 = vld [vmem:[%s5767_s14 + $0x328] sm:$0xff]   ;;  %v5346_v46 = vld [vmem:[%s5767_s14 + $0x370] sm:$0xff]  }
 0xe52   : > { %4911 = vmatprep.subr.bf16.mxu0 %v5310_v47  ;;  %4939 = vmatprep.subr.bf16.mxu1 %v5311_v48  ;;  %v5341_v28 = vld [vmem:[%s5767_s14 + $0x3a0] sm:$0xff]   ;;  %v5345_v32 = vld [vmem:[%s5767_s14 + $0x3a8] sm:$0xff]   ;;  %v5347_v33 = vld [vmem:[%s5767_s14 + $0x3f0] sm:$0xff]   ;;  %v2749_v39 = vpack.c.bf16 %v2717_v10, %v2717_v10  ;;  %v2751_v45 = vpack.c.bf16 %v2719_v16, %v2719_v16 }
 0xe53   : > { %v5348_v17 = vld [vmem:[%s5767_s14 + $0x330] sm:$0xff]   ;;  %v5350_v47 = vld [vmem:[%s5767_s14 + $0x378] sm:$0xff]   ;;  %v4601_v25 = vld [vmem:[%s856_s16] ss:$0 sm:$0xff]  ;;  %s6603_s16 = sld [smem:[#allocation9_spill]] }
 0xe54   : > { %v5349_v62 = vld [vmem:[%s5767_s14 + $0x3b0] sm:$0xff]   ;;  %v5351_v48 = vld [vmem:[%s5767_s14 + $0x3f8] sm:$0xff]  }
 0xe55   : > { %4912 = vmatpush3.bf16.msra.mxu0 %v5312_v50  ;;  %4940 = vmatpush3.bf16.msra.mxu1 %v5313_v63  ;;  %v5352_v50 = vld [vmem:[%s5767_s14 + $0x338] sm:$0xff]  }
 0xe56   : > { %4913 = vmatprep.subr.bf16.mxu0 %v5314_v19  ;;  %4941 = vmatprep.subr.bf16.mxu1 %v5315_v51  ;;  %v5353_v63 = vld [vmem:[%s5767_s14 + $0x3b8] sm:$0xff]   ;;  %v2718_v19 = vmax.f32 %v2618_v49, 0.0  ;;  %v2720_v51 = vmax.f32 %v2669_v2, 0.0 }
 0xe59   : > { %4914 = vmatpush3.bf16.msra.mxu0 %v5316_v52  ;;  %4942 = vmatpush3.bf16.msra.mxu1 %v5317_v26  ;;  %v2750_v52 = vpack.c.bf16 %v2718_v19, %v2718_v19  ;;  %v2752_v26 = vpack.c.bf16 %v2720_v51, %v2720_v51  ;;  %s5123_s30 = smul.u32 384, %s6603_s16 }
 0xe5a   : > { %4915 = vmatprep.subr.bf16.mxu0 %v5318_v53  ;;  %4943 = vmatprep.subr.bf16.mxu1 %v5319_v54 }
 0xe5d   : > { %4916 = vmatpush3.bf16.msra.mxu0 %v5320_v21  ;;  %4944 = vmatpush3.bf16.msra.mxu1 %v5321_v55 }
 0xe5e   : > { %4957 = vmatprep.subr.bf16.mxu0 %v5322_v56  ;;  %4985 = vmatprep.subr.bf16.mxu1 %v5323_v59 }
 0xe60   : > { %4009 = vmatmul.mubr.bf16.vlgmr.msra.gmra.mrb[72].mxu0 %v6274_v15  ;;  %4057 = vmatmul.mubr.bf16.vlgmr.msra.gmra.mrb[72].mxu1 %v6276_v18  ;;  %v2745_v15 = vpack.c.bf16 %v2713_v38, %v2713_v38  ;;  %v2747_v18 = vpack.c.bf16 %v2715_v27, %v2715_v27 }
 0xe61   : > { %4016 = vmatprep.mubr.bf16.mxu0 %v2746_v36  ;;  %4064 = vmatprep.mubr.bf16.mxu1 %v2748_v0 }
 0xe62   : > { %4958 = vmatpush3.bf16.msra.mxu0 %v5324_v42  ;;  %4986 = vmatpush3.bf16.msra.mxu1 %v5325_v6 }
 0xe63   : > { %4959 = vmatprep.subr.bf16.mxu0 %v5326_v1  ;;  %4987 = vmatprep.subr.bf16.mxu1 %v5327_v29 }
 0xe66   : > { %4960 = vmatpush3.bf16.msra.mxu0 %v5328_v31  ;;  %4988 = vmatpush3.bf16.msra.mxu1 %v5329_v5 }
 0xe67   : > { %4961 = vmatprep.subr.bf16.mxu0 %v5330_v8  ;;  %4989 = vmatprep.subr.bf16.mxu1 %v5331_v9 }
 0xe68   : > { %4017 = vmatmul.mubr.bf16.gmra.mrb[76].mxu0 %v2745_v15  ;;  %4065 = vmatmul.mubr.bf16.gmra.mrb[76].mxu1 %v2747_v18 }
 0xe69   : > { %4104 = vmatprep.mubr.bf16.mxu0 %v6338_v34  ;;  %4152 = vmatprep.mubr.bf16.mxu1 %v6340_v44  ;;  %v5342_v34 = vld [vmem:[%s5767_s14 + $0x368] sm:$0xff]  }
 0xe6a   : > { %4962 = vmatpush3.bf16.msra.mxu0 %v5332_v11  ;;  %4990 = vmatpush3.bf16.msra.mxu1 %v5333_v14  ;;  %v5343_v44 = vld [vmem:[%s5767_s14 + $0x3e8] sm:$0xff]  }
 0xe6b   : > { %4963 = vmatprep.subr.bf16.mxu0 %v5334_v7  ;;  %4991 = vmatprep.subr.bf16.mxu1 %v5335_v20 }
 0xe6e   : > { %4964 = vmatpush3.bf16.msra.mxu0 %v5336_v35  ;;  %4992 = vmatpush3.bf16.msra.mxu1 %v5337_v40 }
 0xe6f   : > { %4965 = vmatprep.subr.bf16.mxu0 %v5338_v12  ;;  %4993 = vmatprep.subr.bf16.mxu1 %v5339_v3 }
 0xe72   : > { %4966 = vmatpush3.bf16.msra.mxu0 %v5340_v22  ;;  %4994 = vmatpush3.bf16.msra.mxu1 %v5341_v28 }
 0xe73   : > { %4967 = vmatprep.subr.bf16.mxu0 %v5342_v34  ;;  %4995 = vmatprep.subr.bf16.mxu1 %v5343_v44 }
 0xe76   : > { %4968 = vmatpush3.bf16.msra.mxu0 %v5344_v30  ;;  %4996 = vmatpush3.bf16.msra.mxu1 %v5345_v32 }
 0xe77   : > { %4969 = vmatprep.subr.bf16.mxu0 %v5346_v46  ;;  %4997 = vmatprep.subr.bf16.mxu1 %v5347_v33 }
 0xe7a   : > { %4970 = vmatpush3.bf16.msra.mxu0 %v5348_v17  ;;  %4998 = vmatpush3.bf16.msra.mxu1 %v5349_v62 }
 0xe7b   : > { %4971 = vmatprep.subr.bf16.mxu0 %v5350_v47  ;;  %4999 = vmatprep.subr.bf16.mxu1 %v5351_v48 }
 0xe7e   : > { %4972 = vmatpush3.bf16.msra.mxu0 %v5352_v50  ;;  %5000 = vmatpush3.bf16.msra.mxu1 %v5353_v63 }
 0xe81   : > { %4105 = vmatmul.mubr.bf16.vlgmr.msra.gmra.mrb[80].mxu0 %v6334_v23  ;;  %4153 = vmatmul.mubr.bf16.vlgmr.msra.gmra.mrb[80].mxu1 %v6336_v43 }
 0xe82   : > { %4112 = vmatprep.mubr.bf16.mxu0 %v2750_v52  ;;  %4160 = vmatprep.mubr.bf16.mxu1 %v2752_v26 }
 0xe89   : > { %4113 = vmatmul.mubr.bf16.gmra.mrb[84].mxu0 %v2749_v39  ;;  %4161 = vmatmul.mubr.bf16.gmra.mrb[84].mxu1 %v2751_v45 }
 0xef2   : > { %v4805_v53 = vpop.f32.mrb[56].mxu0  ;;  %v4833_v54 = vpop.f32.mrb[56].mxu1 }
 0xef3   : > { %v4806_v23 = vpop.f32.mrb[57].mxu0  ;;  %v4834_v58 = vpop.f32.mrb[57].mxu1 }
 0xef4   : > { %v4807_v43 = vadd.f32 %v4806_v23, %v4805_v53  ;;  %v4835_v21 = vadd.f32 %v4834_v58, %v4833_v54  ;;  %v4808_v55 = vpop.f32.mrb[58].mxu0  ;;  %v4836_v56 = vpop.f32.mrb[58].mxu1 }
 0xef5   : > { %v4809_v13 = vpop.f32.mrb[59].mxu0  ;;  %v4837_v59 = vpop.f32.mrb[59].mxu1 }
 0xef6   : > { %v3819_v4 = vadd.f32 %v4807_v43, %v4601_v25  ;;  %v4810_v60 = vadd.f32 %v4809_v13, %v4808_v55  ;;  %v4838_v61 = vadd.f32 %v4837_v59, %v4836_v56 }
 0xef8   : > { %v3867_v41 = vadd.f32 %v4835_v21, %v3819_v4  ;;  %v3822_v42 = vadd.f32 %v4810_v60, %v4601_v25 }
 0xefa   : > { %v3870_v6 = vadd.f32 %v4838_v61, %v3822_v42  ;;  %v4811_v36 = vpop.f32.mrb[60].mxu0  ;;  %v4839_v0 = vpop.f32.mrb[60].mxu1 }
 0xefb   : > { %v4812_v1 = vpop.f32.mrb[61].mxu0  ;;  %v4840_v29 = vpop.f32.mrb[61].mxu1 }
 0xefc   : > { %v4813_v38 = vadd.f32 %v4812_v1, %v4811_v36  ;;  %v4841_v27 = vadd.f32 %v4840_v29, %v4839_v0  ;;  %v4814_v31 = vpop.f32.mrb[62].mxu0  ;;  %v4842_v5 = vpop.f32.mrb[62].mxu1 }
 0xefd   : > { %v4815_v8 = vpop.f32.mrb[63].mxu0  ;;  %v4843_v9 = vpop.f32.mrb[63].mxu1 }
 0xefe   : > { %v3827_v15 = vadd.f32 %v4813_v38, %v4601_v25 }
 0xf00   : > { %v3875_v18 = vadd.f32 %v4841_v27, %v3827_v15 }
 0xf12   : > { %v4861_v11 = vpop.f32.mrb[64].mxu0  ;;  %v4889_v14 = vpop.f32.mrb[64].mxu1 }
 0xf13   : > { %v4862_v7 = vpop.f32.mrb[65].mxu0  ;;  %v4890_v20 = vpop.f32.mrb[65].mxu1 }
 0xf14   : > { %v4863_v35 = vadd.f32 %v4862_v7, %v4861_v11  ;;  %v4891_v40 = vadd.f32 %v4890_v20, %v4889_v14  ;;  %v4864_v12 = vpop.f32.mrb[66].mxu0  ;;  %v4892_v3 = vpop.f32.mrb[66].mxu1 }
 0xf15   : > { %v4865_v22 = vpop.f32.mrb[67].mxu0  ;;  %v4893_v28 = vpop.f32.mrb[67].mxu1 }
 0xf16   : > { %v3915_v34 = vadd.f32 %v4863_v35, %v3867_v41  ;;  %v4866_v44 = vadd.f32 %v4865_v22, %v4864_v12  ;;  %v4894_v30 = vadd.f32 %v4893_v28, %v4892_v3 }
 0xf18   : > { %v3963_v32 = vadd.f32 %v4891_v40, %v3915_v34  ;;  %v3918_v46 = vadd.f32 %v4866_v44, %v3870_v6 }
 0xf1a   : > { %v3966_v33 = vadd.f32 %v4894_v30, %v3918_v46  ;;  %v4867_v17 = vpop.f32.mrb[68].mxu0  ;;  %v4895_v62 = vpop.f32.mrb[68].mxu1 }
 0xf1b   : > { %v4868_v47 = vpop.f32.mrb[69].mxu0  ;;  %v4896_v48 = vpop.f32.mrb[69].mxu1 }
 0xf1c   : > { %v4869_v49 = vadd.f32 %v4868_v47, %v4867_v17  ;;  %v4897_v2 = vadd.f32 %v4896_v48, %v4895_v62  ;;  %v4870_v50 = vpop.f32.mrb[70].mxu0  ;;  %v4898_v63 = vpop.f32.mrb[70].mxu1 }
 0xf1d   : > { %v4871_v19 = vpop.f32.mrb[71].mxu0  ;;  %v4899_v51 = vpop.f32.mrb[71].mxu1 }
 0xf1e   : > { %v3923_v52 = vadd.f32 %v4869_v49, %v3875_v18 }
 0xf20   : > { %v3971_v26 = vadd.f32 %v4897_v2, %v3923_v52 }
 0xf33   : > { %v4917_v10 = vpop.f32.mrb[72].mxu0  ;;  %v4945_v16 = vpop.f32.mrb[72].mxu1 }
 0xf34   : > { %v4918_v39 = vpop.f32.mrb[73].mxu0  ;;  %v4946_v45 = vpop.f32.mrb[73].mxu1 }
 0xf35   : > { %v4919_v53 = vadd.f32 %v4918_v39, %v4917_v10  ;;  %v4947_v54 = vadd.f32 %v4946_v45, %v4945_v16  ;;  %v4920_v25 = vpop.f32.mrb[74].mxu0  ;;  %v4948_v23 = vpop.f32.mrb[74].mxu1 }
 0xf36   : > { %v4921_v58 = vpop.f32.mrb[75].mxu0  ;;  %v4949_v43 = vpop.f32.mrb[75].mxu1 }
 0xf37   : > { %v4011_v21 = vadd.f32 %v4919_v53, %v3963_v32  ;;  %v4922_v55 = vadd.f32 %v4921_v58, %v4920_v25  ;;  %v4950_v56 = vadd.f32 %v4949_v43, %v4948_v23 }
 0xf39   : > { %v4059_v13 = vadd.f32 %v4947_v54, %v4011_v21  ;;  %v4014_v59 = vadd.f32 %v4922_v55, %v3966_v33 }
 0xf3b   : > { %v4062_v4 = vadd.f32 %v4950_v56, %v4014_v59  ;;  %v4923_v60 = vpop.f32.mrb[76].mxu0  ;;  %v4951_v61 = vpop.f32.mrb[76].mxu1 }
 0xf3c   : > { %v4924_v41 = vpop.f32.mrb[77].mxu0  ;;  %v4952_v42 = vpop.f32.mrb[77].mxu1 }
 0xf3d   : > { %v4925_v6 = vadd.f32 %v4924_v41, %v4923_v60  ;;  %v4953_v36 = vadd.f32 %v4952_v42, %v4951_v61  ;;  %v4926_v0 = vpop.f32.mrb[78].mxu0  ;;  %v4954_v1 = vpop.f32.mrb[78].mxu1 }
 0xf3e   : > { %v4927_v29 = vpop.f32.mrb[79].mxu0  ;;  %v4955_v38 = vpop.f32.mrb[79].mxu1  ;;  %v4730_v1 = vld [vmem:[%s859_s28] ss:$0 sm:$0xff]  ;;  %s4247_s28 = sshll.u32 %s5777_s24, 4  ;;  %s6450_s28 = int_to_ptr.vmem [resolvable:$true] %s4247_s28 }
 0xf3f   : > { %v4019_v27 = vadd.f32 %v4925_v6, %v3971_v26  ;;  %s5417_s25 = scalar_lea.vmem %s6450_s28, 384  ;;  %p5424_p5 = scmp.lt.s32.totalorder %s6450_s28, %s5422_s18 }
 0xf40   : > { %p5418_p1 = scmp.ne.s32.totalorder %s6450_s28, %s5417_s25  ;;  %p5425_p6 = scmp.lt.s32.totalorder %s5423_s1, %s5417_s25 }
 0xf41   : > { %v4067_v31 = vadd.f32 %v4953_v36, %v4019_v27  ;;  %v4731_v27 = vld [vmem:[%s862_s0] ss:$0 sm:$0xff]  ;;  %s6608_s0 = sld [smem:[#allocation33_spill]] }
 0xf42   : > { %p5419_p2 = pnand %p5418_p1, %p5666_p3  ;;  %p5426_p7 = por %p5425_p6, %p5424_p5 }
 0xf44   : > { %p5420_p4 = pneg %p5419_p2 }
 0xf46   : > { %p5427_p8 = pnand %p5426_p7, %p5420_p4 }
 0xf47   : > { %s6609_s22 = smov %s6608_s0  ;;  %s6448_s20 = scalar_lea.hbm %s6608_s0, %s5123_s30 }
 0xf54   : > { %v4973_v5 = vpop.f32.mrb[80].mxu0  ;;  %v5001_v8 = vpop.f32.mrb[80].mxu1 }
 0xf55   : > { %v4974_v9 = vpop.f32.mrb[81].mxu0  ;;  %v5002_v15 = vpop.f32.mrb[81].mxu1 }
 0xf56   : > { %v4975_v18 = vadd.f32 %v4974_v9, %v4973_v5  ;;  %v5003_v11 = vadd.f32 %v5002_v15, %v5001_v8  ;;  %v4976_v14 = vpop.f32.mrb[82].mxu0  ;;  %v5004_v7 = vpop.f32.mrb[82].mxu1 }
 0xf57   : > { %v4977_v20 = vpop.f32.mrb[83].mxu0  ;;  %v5005_v35 = vpop.f32.mrb[83].mxu1 }
 0xf58   : > { %v4107_v40 = vadd.f32 %v4975_v18, %v4059_v13  ;;  %v4978_v12 = vadd.f32 %v4977_v20, %v4976_v14  ;;  %v5006_v3 = vadd.f32 %v5005_v35, %v5004_v7 }
 0xf5a   : > { %v4155_v22 = vadd.f32 %v5003_v11, %v4107_v40  ;;  %v4110_v28 = vadd.f32 %v4978_v12, %v4062_v4 }
 0xf5c   : > { %v4158_v34 = vadd.f32 %v5006_v3, %v4110_v28  ;;  %v4979_v44 = vpop.f32.mrb[84].mxu0  ;;  %v5007_v30 = vpop.f32.mrb[84].mxu1  ;;  %v4170_v32 = vadd.f32 %v4155_v22, %v6039_v57 }
 0xf5d   : > { %v4980_v46 = vpop.f32.mrb[85].mxu0  ;;  %v5008_v33 = vpop.f32.mrb[85].mxu1 }
 0xf5e   : > { %v4981_v17 = vadd.f32 %v4980_v46, %v4979_v44  ;;  %v5009_v62 = vadd.f32 %v5008_v33, %v5007_v30  ;;  %v4982_v47 = vpop.f32.mrb[86].mxu0  ;;  %v5010_v48 = vpop.f32.mrb[86].mxu1  ;;  %v4173_v49 = vsel %vm903_vm1, %v4170_v32, 0.0  ;;  %v4171_v2 = vadd.f32 %v4158_v34, %v6041_v37 }
 0xf5f   : > { %v4983_v50 = vpop.f32.mrb[87].mxu0  ;;  %v5011_v63 = vpop.f32.mrb[87].mxu1  ;;  %4174 = vadd.xlane.f32.xlu0 %v4173_v49 }
 0xf60   : > { %v4115_v19 = vadd.f32 %v4981_v17, %v4067_v31  ;;  %v4176_v51 = vsel %vm903_vm1, %v4171_v2, 0.0 }
 0xf61   : > { %4177 = vadd.xlane.f32.xlu1 %v4176_v51 }
 0xf62   : > { %v4163_v52 = vadd.f32 %v5009_v62, %v4115_v19 }
 0xf64   : > { %v4172_v57 = vadd.f32 %v4163_v52, %v6060_v24 }
 0xf66   : > { %v4179_v26 = vsel %vm903_vm1, %v4172_v57, 0.0 }
 0xf67   : > { %4180 = vadd.xlane.f32.xlu0 %v4179_v26 }
 0xfec   : > { %v4175_v10 = vpop.xlane.xlu0 %4174 }
 0xfed   : > { %v4182_v16 = vmul.f32 0.03125, %v4175_v10 }
 0xfee   : > { %v4178_v39 = vpop.xlane.xlu1 %4177 }
 0xfef   : > { %v4185_v45 = vsub.f32 %v4170_v32, %v4182_v16  ;;  %v4183_v53 = vmul.f32 0.03125, %v4178_v39 }
 0xff1   : > { %v4186_v54 = vsub.f32 %v4171_v2, %v4183_v53  ;;  %v4188_v37 = vmul.f32 %v4185_v45, %v4185_v45 }
 0xff3   : > { %v4191_v25 = vsel %vm903_vm1, %v4188_v37, 0.0  ;;  %v4189_v23 = vmul.f32 %v4186_v54, %v4186_v54 }
 0xff4   : > { %4192 = vadd.xlane.f32.xlu1 %v4191_v25  ;;  %v4181_v58 = vpop.xlane.xlu0 %4180 }
 0xff5   : > { %v4184_v43 = vmul.f32 0.03125, %v4181_v58  ;;  %v4194_v21 = vsel %vm903_vm1, %v4189_v23, 0.0 }
 0xff6   : > { %4195 = vadd.xlane.f32.xlu0 %v4194_v21 }
 0xff7   : > { %v4187_v24 = vsub.f32 %v4172_v57, %v4184_v43 }
 0xff9   : > { %v4190_v55 = vmul.f32 %v4187_v24, %v4187_v24 }
 0xffb   : > { %v4197_v56 = vsel %vm903_vm1, %v4190_v55, 0.0 }
 0xffc   : > { %4198 = vadd.xlane.f32.xlu1 %v4197_v56 }
0x1081   : > { %v4193_v13 = vpop.xlane.xlu1 %4192 }
0x1082   : > { %v4200_v59 = vmul.f32 0.03125, %v4193_v13 }
0x1083   : > { %v4196_v4 = vpop.xlane.xlu0 %4195 }
0x1084   : > { %v4203_v60 = vadd.f32 1e-05, %v4200_v59  ;;  %v4201_v61 = vmul.f32 0.03125, %v4196_v4 }
0x1086   : > { %5408 = vrsqrt.f32 %v4203_v60  ;;  %v4204_v41 = vadd.f32 1e-05, %v4201_v61 }
0x1088   : > { %5410 = vrsqrt.f32 %v4204_v41 }
0x1089   : > { %v4199_v42 = vpop.xlane.xlu1 %4198 }
0x108a   : > { %v4202_v6 = vmul.f32 0.03125, %v4199_v42 }
0x108c   : > { %v4205_v36 = vadd.f32 1e-05, %v4202_v6 }
0x108e   : > { %5412 = vrsqrt.f32 %v4205_v36 }
0x1090   : > { %v5409_v0 = vpop.eup %5408 }
0x1091   : > { %v4209_v29 = vmul.f32 %v5409_v0, %v4185_v45 }
0x1092   : > { %v5411_v38 = vpop.eup %5410 }
0x1093   : > { %v4218_v31 = vmul.f32 %v4730_v1, %v4209_v29  ;;  %v4210_v5 = vmul.f32 %v5411_v38, %v4186_v54 }
0x1095   : > { %v4227_v8 = vadd.f32 %v4731_v27, %v4218_v31  ;;  %v4219_v9 = vmul.f32 %v4730_v1, %v4210_v5 }
0x1097   : > { %4230 = vst.msk [vmem:[%s5777_s24] sm:$0xff] %vm903_vm1, %v4227_v8  ;;  %v4228_v15 = vadd.f32 %v4731_v27, %v4219_v9 }
0x1098   : > { %v5413_v18 = vpop.eup %5412 }
0x1099   : > { %4231 = vst.msk [vmem:[%s5777_s24 + $0x8] sm:$0xff] %vm903_vm1, %v4228_v15  ;;  %v4211_v11 = vmul.f32 %v5413_v18, %v4187_v24 }
0x109b   : > { %v4220_v14 = vmul.f32 %v4730_v1, %v4211_v11 }
0x109d   : > { %v4229_v7 = vadd.f32 %v4731_v27, %v4220_v14 }
0x109f   : > { %4232 = vst.msk [vmem:[%s5777_s24 + $0x10] sm:$0xff] %vm903_vm1, %v4229_v7 }
0x10a0   : > { %5430 = shalt.err (!%p5427_p8)
}
0x10a1   : > { %s5431_s24 = scalar_lea.hbm %s6448_s20, 384  ;;  %s5435_s16 = scalar_lea.hbm %s6609_s22, 768 }
0x10a2   : > { %p5432_p10 = scmp.ne.s32.totalorder %s6448_s20, %s5431_s24  ;;  %p5436_p13 = scmp.lt.u32.totalorder %s6448_s20, %s6609_s22 }
0x10a3   : > { %p5437_p0 = scmp.lt.u32.totalorder %s5435_s16, %s5431_s24  ;;  %p5439_p2 = scmp.lt.u32.totalorder %s5431_s24, %s6448_s20 }
0x10a4   : > { %p5433_p11 = pnand %p5432_p10, %p5666_p3 }
0x10a5   : > { %p5438_p1 = por %p5437_p0, %p5436_p13 }
0x10a6   : > { %p5434_p12 = pneg %p5433_p11 }
0x10a7   : > { %p5440_p4 = por %p5439_p2, %p5438_p1 }
0x10a9   : > { %p5441_p5 = pnand %p5440_p4, %p5434_p12 }
0x10ab   : > { %5444 = shalt.err (!%p5441_p5)
}
0x10ac   : > { %s5521_s21 = smov 128  }
0x10ad   : > { %5124 = dma.vmem_to_hbm [thread:$0]  (%p5666_p3), %s6450_s28, 384, %s6448_s20, %s6456_s27, %s5521_s21, %s5521_s21, %s5516_s10  }
0x10ae PF: > { %s6611_s3 = sld [smem:[#allocation12_spill]]  ;;  %s6612_s4 = sld [smem:[#allocation5_spill]] }
0x10b4   : > { %p5130_p6 = scmp.ge.s32.totalorder %s6611_s3, 2  ;;  %s4262_s12 = sand.u32 1, %s6612_s4  }
0x10b5   : > { %s4263_s30 = scalar_lea.sflag [#allocation3], %s4262_s12 }
0x10b6   : > { %p5127_p7 = pnand %p5130_p6, %p5676_p9 }
0x10b8   : > { %5478 = dma.done.wait (!%p5127_p7), %s4263_s30, 384  }
0x10b9   : > { %5480 = vsyncadd (!%p5127_p7), %s4263_s30, 4294966912  ;;  %s31_s20 = sadd.s32 1, %s6611_s3   ;;  %s6614_s27 = sld [smem:[#allocation6_spill]] }
0x10ba   : > { %p28_p8 = scmp.ge.s32.totalorder %s31_s20, 6   ;;  %s6615_s28 = sld [smem:[#allocation7_spill]] }
0x10bb   : > { %s6616_s29 = sld [smem:[#allocation17_spill]]  ;;  %s6617_s30 = sld [smem:[#allocation10_spill]] }
0x10bc   : > { %s6618_s0 = sld [smem:[#allocation11_spill]]  ;;  %s6619_s19 = sld [smem:[#allocation13_spill]] }
0x10bd   : > { %s6620_s1 = sld [smem:[#allocation15_spill]]  ;;  %30 = sbr.rel (!%p28_p8) target bundleno = 20 (0x14), region = 182 }
0x10c4   :  { %4268 = vsyncpa [#allocation3], 1 }
0x10c5   :  { %4270 = vsyncpa [#allocation3 + $0x1], 1 }

</bundles_post_ra>
